<compile_context>
chip_gen: v5e
topology: v5e:2x2
jax: 0.10.0
libtpu: 0.0.40
codegen_flags: <defaults>
</compile_context>

<pallas_src>
import jax
import jax.numpy as jnp
from jax.experimental import pallas as pl
from jax.experimental.pallas import tpu as pltpu


# ----------------------------- kernel helpers --------------------------------
def _silu(v):
    # v * sigmoid(v); reciprocal goes to the (otherwise idle) EUP slot.
    return v * pl.reciprocal(1.0 + jnp.exp(-v), approx=True)


def _softplus(v):
    # numerically stable softplus
    return jnp.maximum(v, 0.0) + jnp.log1p(jnp.exp(-jnp.abs(v)))


# ----------------------------- Pallas kernel ---------------------------------
def mamba_block_decode_kernel(
    # inputs
    x_ref,           # (B, d_model)            f32
    in_w_ref,        # (d_model, 2*d_inner)    bf16   [mlp | ssm] fused in_proj
    conv_state_ref,  # (4, B, d_inner)         f32    previous taps 0..3
    conv_w_ref,      # (4, d_inner)            f32    depthwise conv taps
    conv_b_ref,      # (1, d_inner)            f32
    xdt_w_ref,       # (d_inner, dt_rank)      bf16
    xB_w_ref,        # (d_inner, d_state)      bf16
    xC_w_ref,        # (d_inner, d_state)      bf16
    dtp_w_ref,       # (dt_rank, d_inner)      bf16
    dt_b_ref,        # (1, d_inner)            f32
    A_ref,           # (d_state, d_inner)      f32    = -exp(A_log), host-precomputed
    D_ref,           # (1, d_inner)            f32
    h_ref,           # (B, d_state, d_inner)   f32
    out_w_ref,       # (d_inner, d_model)      bf16
    # outputs
    out_ref,         # (B, d_model)            f32
    conv_new_ref,    # (4, B, d_inner)         f32    (aliased with conv_state)
    h_new_ref,       # (B, d_state, d_inner)   f32    (aliased with h)
):
    f32 = jnp.float32
    bf16 = jnp.bfloat16
    d_inner = in_w_ref.shape[1] // 2

    # ---- fused in-projection (mlp || ssm): one lane-dense bf16 MXU matmul ---
    xb = x_ref[...].astype(bf16)
    proj = jnp.dot(xb, in_w_ref[...], preferred_element_type=f32)  # (B, 2*d_inner)
    res = _silu(proj[:, :d_inner])       # residual branch with fused silu
    x_ssm = proj[:, d_inner:]            # becomes new conv tap #3

    # ---- roll conv state in-kernel + depthwise conv1d (k=4) decode step -----
    t0 = conv_state_ref[1]
    t1 = conv_state_ref[2]
    t2 = conv_state_ref[3]
    conv_new_ref[0] = t0
    conv_new_ref[1] = t1
    conv_new_ref[2] = t2
    conv_new_ref[3] = x_ssm

    cw = conv_w_ref[...]
    conv = (t0 * cw[0:1, :] + t1 * cw[1:2, :] + t2 * cw[2:3, :]
            + x_ssm * cw[3:4, :] + conv_b_ref[...])
    u = _silu(conv)                                   # (B, d_inner) f32
    ub = u.astype(bf16)

    # ---- selective-scan single step (TtMambaSSM decode) ---------------------
    dt_low = jnp.dot(ub, xdt_w_ref[...], preferred_element_type=f32)   # (B, dt_rank)
    Bm = jnp.dot(ub, xB_w_ref[...], preferred_element_type=f32)        # (B, d_state)
    Cm = jnp.dot(ub, xC_w_ref[...], preferred_element_type=f32)        # (B, d_state)
    delta = jnp.dot(dt_low.astype(bf16), dtp_w_ref[...],
                    preferred_element_type=f32) + dt_b_ref[...]
    delta = _softplus(delta)                          # (B, d_inner)

    # lane-dense state update: all big tensors are (B, d_state, d_inner)
    dA = jnp.exp(delta[:, None, :] * A_ref[...][None, :, :])
    du = delta * u                                    # (B, d_inner)
    dBu = du[:, None, :] * Bm[:, :, None]
    h_new = dA * h_ref[...] + dBu
    h_new_ref[...] = h_new

    y = jnp.sum(h_new * Cm[:, :, None], axis=1) + u * D_ref[...]      # (B, d_inner)

    # ---- gate with residual, output projection ------------------------------
    gated = (y * res).astype(bf16)
    out_ref[...] = jnp.dot(gated, out_w_ref[...], preferred_element_type=f32)


# ------------------------------- wrapper --------------------------------------
def _mamba_block_decode(x, params, conv_state, h_prev):
    """x: (B, d_model) f32.  Returns (out, new_conv_state, new_h)."""
    B, d_model = x.shape

    vmem = pl.BlockSpec(memory_space=pltpu.MemorySpace.VMEM)
    inputs = (
        x,                   # 0
        params["in_w"],      # 1
        conv_state,          # 2  -> aliased with output 1
        params["conv_w"],    # 3
        params["conv_b"],    # 4
        params["xdt_w"],     # 5
        params["xB_w"],      # 6
        params["xC_w"],      # 7
        params["dtp_w"],     # 8
        params["dt_b"],      # 9
        params["A"],         # 10
        params["D"],         # 11
        h_prev,              # 12 -> aliased with output 2
        params["out_w"],     # 13
    )
    out_shapes = (
        jax.ShapeDtypeStruct((B, d_model), jnp.float32),
        jax.ShapeDtypeStruct(conv_state.shape, conv_state.dtype),
        jax.ShapeDtypeStruct(h_prev.shape, h_prev.dtype),
    )
    return pl.pallas_call(
        mamba_block_decode_kernel,
        out_shape=out_shapes,
        in_specs=[vmem] * len(inputs),
        out_specs=(vmem, vmem, vmem),
        input_output_aliases={2: 1, 12: 2},   # in-place recurrent state update
    )(*inputs)


# donate the recurrent-state buffers so the in-place aliasing is real
tt_mamba_block_decode = jax.jit(_mamba_block_decode, donate_argnums=(2, 3))


# ---------------------------- pure-JAX reference -------------------------------
def reference(x, p, conv_state, h_prev):
    f32, bf16 = jnp.float32, jnp.bfloat16
    d_inner = p["in_w"].shape[1] // 2
    proj = jnp.dot(x.astype(bf16), p["in_w"], preferred_element_type=f32)
    res = jax.nn.silu(proj[:, :d_inner])
    x_ssm = proj[:, d_inner:]

    new_conv = jnp.concatenate([conv_state[1:], x_ssm[None]], axis=0)
    cw = p["conv_w"]
    conv = (new_conv * cw[:, None, :]).sum(0) + p["conv_b"]
    u = jax.nn.silu(conv)
    ub = u.astype(bf16)

    dt_low = jnp.dot(ub, p["xdt_w"], preferred_element_type=f32)
    Bm = jnp.dot(ub, p["xB_w"], preferred_element_type=f32)
    Cm = jnp.dot(ub, p["xC_w"], preferred_element_type=f32)
    delta = jax.nn.softplus(
        jnp.dot(dt_low.astype(bf16), p["dtp_w"], preferred_element_type=f32)
        + p["dt_b"])

    dA = jnp.exp(delta[:, None, :] * p["A"][None, :, :])
    dBu = (delta * u)[:, None, :] * Bm[:, :, None]
    h_new = dA * h_prev + dBu
    y = jnp.sum(h_new * Cm[:, :, None], axis=1) + u * p["D"]
    out = jnp.dot((y * res).astype(bf16), p["out_w"], preferred_element_type=f32)
    return out, new_conv, h_new


# --------------------------------- main ----------------------------------------
if __name__ == "__main__":
    # small ModelArgs-consistent shapes (decode: one token per user)
    B = 8            # num_users / batch_size
    d_model = 128
    d_inner = 256    # = 2 * d_model (expand = 2)
    d_state = 16
    dt_rank = 16

    key = jax.random.PRNGKey(0)
    ks = jax.random.split(key, 16)
    n = lambda k, shape, s=0.1: (s * jax.random.normal(k, shape)).astype(jnp.float32)

    # in_proj.weight: mlp half (rows d_inner:) and ssm half (rows :d_inner),
    # both transposed -> packed into one (d_model, 2*d_inner) bf16 weight.
    mlp_w = n(ks[0], (d_model, d_inner))
    ssm_w = n(ks[1], (d_model, d_inner))
    A_log = n(ks[9], (d_state, d_inner), 0.5)     # lane-dense (d_inner last)

    params = {
        "in_w": jnp.concatenate([mlp_w, ssm_w], axis=1).astype(jnp.bfloat16),
        "conv_w": n(ks[2], (4, d_inner)),                       # conv1d taps
        "conv_b": n(ks[3], (1, d_inner)),                       # conv1d bias
        "xdt_w": n(ks[4], (d_inner, dt_rank)).astype(jnp.bfloat16),
        "xB_w": n(ks[5], (d_inner, d_state)).astype(jnp.bfloat16),
        "xC_w": n(ks[6], (d_inner, d_state)).astype(jnp.bfloat16),
        "dtp_w": n(ks[7], (dt_rank, d_inner)).astype(jnp.bfloat16),
        "dt_b": n(ks[8], (1, d_inner)),
        "A": (-jnp.exp(A_log)).astype(jnp.float32),             # host-precomputed
        "D": n(ks[10], (1, d_inner)),
        "out_w": n(ks[11], (d_inner, d_model)).astype(jnp.bfloat16),
    }

    # x is the flattened (1,1,B,d_model) decode input
    x = n(ks[12], (B, d_model), 1.0)
    conv_state = n(ks[13], (4, B, d_inner), 0.5)          # taps 0..3
    h_prev = n(ks[14], (B, d_state, d_inner), 0.5)        # lane-dense SSM state

    # reference FIRST (conv_state / h_prev are donated to the kernel call)
    ref_out, ref_conv, ref_h = reference(x, params, conv_state, h_prev)
    jax.block_until_ready((ref_out, ref_conv, ref_h))

    out, conv_new, h_new = tt_mamba_block_decode(x, params, conv_state, h_prev)
    jax.block_until_ready((out, conv_new, h_new))

    assert jnp.allclose(out, ref_out, rtol=2e-2, atol=2e-2), "out mismatch"
    assert jnp.allclose(conv_new, ref_conv, rtol=2e-2, atol=2e-2), "conv state mismatch"
    assert jnp.allclose(h_new, ref_h, rtol=2e-2, atol=2e-2), "ssm state mismatch"

    print("KERNEL_OK")
</pallas_src>

<mosaic_0001>
module attributes {stable_mosaic.version = 11 : i64} {
  func.func @mamba_block_decode_kernel(%arg0: memref<8x128xf32, #tpu.memory_space<vmem>>, %arg1: memref<128x512xbf16, #tpu.memory_space<vmem>>, %arg2: memref<4x8x256xf32, #tpu.memory_space<vmem>>, %arg3: memref<4x256xf32, #tpu.memory_space<vmem>>, %arg4: memref<1x256xf32, #tpu.memory_space<vmem>>, %arg5: memref<256x16xbf16, #tpu.memory_space<vmem>>, %arg6: memref<256x16xbf16, #tpu.memory_space<vmem>>, %arg7: memref<256x16xbf16, #tpu.memory_space<vmem>>, %arg8: memref<16x256xbf16, #tpu.memory_space<vmem>>, %arg9: memref<1x256xf32, #tpu.memory_space<vmem>>, %arg10: memref<16x256xf32, #tpu.memory_space<vmem>>, %arg11: memref<1x256xf32, #tpu.memory_space<vmem>>, %arg12: memref<8x16x256xf32, #tpu.memory_space<vmem>>, %arg13: memref<256x128xbf16, #tpu.memory_space<vmem>>, %arg14: memref<8x128xf32, #tpu.memory_space<vmem>>, %arg15: memref<4x8x256xf32, #tpu.memory_space<vmem>>, %arg16: memref<8x16x256xf32, #tpu.memory_space<vmem>>) attributes {dimension_semantics = [], scalar_prefetch = 0 : i64, scratch_operands = 0 : i64, tpu.core_type = #tpu.core_type<tc>} {
    %c0 = arith.constant 0 : index
    %c0_0 = arith.constant 0 : index
    %0 = vector.load %arg0[%c0, %c0_0] : memref<8x128xf32, #tpu.memory_space<vmem>>, vector<8x128xf32>
    %1 = arith.truncf %0 : vector<8x128xf32> to vector<8x128xbf16>
    %c0_1 = arith.constant 0 : index
    %c0_2 = arith.constant 0 : index
    %2 = vector.load %arg1[%c0_1, %c0_2] : memref<128x512xbf16, #tpu.memory_space<vmem>>, vector<128x512xbf16>
    %cst = arith.constant dense<0.000000e+00> : vector<8x512xf32>
    %3 = tpu.matmul %1, %2, %cst {dimension_numbers = #tpu.dot_dimension_numbers<[1], [0], [0], [1], [0, 0, 1, 1], [], []>} : vector<8x128xbf16>, vector<128x512xbf16>, vector<8x512xf32> -> vector<8x512xf32>
    %4 = vector.extract_strided_slice %3 {offsets = [0, 0], sizes = [8, 256], strides = [1, 1]} : vector<8x512xf32> to vector<8x256xf32>
    %cst_3 = arith.constant 0.000000e+00 : f32
    %5 = vector.broadcast %cst_3 : f32 to vector<8x256xf32>
    %6 = arith.subf %5, %4 : vector<8x256xf32>
    %7 = math.exp %6 : vector<8x256xf32>
    %cst_4 = arith.constant 1.000000e+00 : f32
    %8 = vector.broadcast %cst_4 : f32 to vector<8x256xf32>
    %9 = arith.addf %8, %7 : vector<8x256xf32>
    %10 = tpu.reciprocal %9 {approx = true} : vector<8x256xf32> -> vector<8x256xf32>
    %11 = arith.mulf %4, %10 : vector<8x256xf32>
    %12 = vector.extract_strided_slice %3 {offsets = [0, 256], sizes = [8, 256], strides = [1, 1]} : vector<8x512xf32> to vector<8x256xf32>
    %c1 = arith.constant 1 : index
    %c0_5 = arith.constant 0 : index
    %c0_6 = arith.constant 0 : index
    %13 = vector.load %arg2[%c1, %c0_5, %c0_6] : memref<4x8x256xf32, #tpu.memory_space<vmem>>, vector<1x8x256xf32>
    %14 = vector.shape_cast %13 : vector<1x8x256xf32> to vector<8x256xf32>
    %c2 = arith.constant 2 : index
    %c0_7 = arith.constant 0 : index
    %c0_8 = arith.constant 0 : index
    %15 = vector.load %arg2[%c2, %c0_7, %c0_8] : memref<4x8x256xf32, #tpu.memory_space<vmem>>, vector<1x8x256xf32>
    %16 = vector.shape_cast %15 : vector<1x8x256xf32> to vector<8x256xf32>
    %c3 = arith.constant 3 : index
    %c0_9 = arith.constant 0 : index
    %c0_10 = arith.constant 0 : index
    %17 = vector.load %arg2[%c3, %c0_9, %c0_10] : memref<4x8x256xf32, #tpu.memory_space<vmem>>, vector<1x8x256xf32>
    %18 = vector.shape_cast %17 : vector<1x8x256xf32> to vector<8x256xf32>
    %c0_11 = arith.constant 0 : index
    %c0_12 = arith.constant 0 : index
    %c0_13 = arith.constant 0 : index
    %19 = vector.load %arg15[%c0_11, %c0_12, %c0_13] : memref<4x8x256xf32, #tpu.memory_space<vmem>>, vector<1x8x256xf32>
    %20 = vector.shape_cast %19 : vector<1x8x256xf32> to vector<8x256xf32>
    %21 = vector.shape_cast %14 : vector<8x256xf32> to vector<1x8x256xf32>
    tpu.vector_store %arg15[%c0_11, %c0_12, %c0_13], %21 {strides = array<i32>} : memref<4x8x256xf32, #tpu.memory_space<vmem>>, vector<1x8x256xf32>,
    %c1_14 = arith.constant 1 : index
    %c0_15 = arith.constant 0 : index
    %c0_16 = arith.constant 0 : index
    %22 = vector.load %arg15[%c1_14, %c0_15, %c0_16] : memref<4x8x256xf32, #tpu.memory_space<vmem>>, vector<1x8x256xf32>
    %23 = vector.shape_cast %22 : vector<1x8x256xf32> to vector<8x256xf32>
    %24 = vector.shape_cast %16 : vector<8x256xf32> to vector<1x8x256xf32>
    tpu.vector_store %arg15[%c1_14, %c0_15, %c0_16], %24 {strides = array<i32>} : memref<4x8x256xf32, #tpu.memory_space<vmem>>, vector<1x8x256xf32>,
    %c2_17 = arith.constant 2 : index
    %c0_18 = arith.constant 0 : index
    %c0_19 = arith.constant 0 : index
    %25 = vector.load %arg15[%c2_17, %c0_18, %c0_19] : memref<4x8x256xf32, #tpu.memory_space<vmem>>, vector<1x8x256xf32>
    %26 = vector.shape_cast %25 : vector<1x8x256xf32> to vector<8x256xf32>
    %27 = vector.shape_cast %18 : vector<8x256xf32> to vector<1x8x256xf32>
    tpu.vector_store %arg15[%c2_17, %c0_18, %c0_19], %27 {strides = array<i32>} : memref<4x8x256xf32, #tpu.memory_space<vmem>>, vector<1x8x256xf32>,
    %c3_20 = arith.constant 3 : index
    %c0_21 = arith.constant 0 : index
    %c0_22 = arith.constant 0 : index
    %28 = vector.load %arg15[%c3_20, %c0_21, %c0_22] : memref<4x8x256xf32, #tpu.memory_space<vmem>>, vector<1x8x256xf32>
    %29 = vector.shape_cast %28 : vector<1x8x256xf32> to vector<8x256xf32>
    %30 = vector.shape_cast %12 : vector<8x256xf32> to vector<1x8x256xf32>
    tpu.vector_store %arg15[%c3_20, %c0_21, %c0_22], %30 {strides = array<i32>} : memref<4x8x256xf32, #tpu.memory_space<vmem>>, vector<1x8x256xf32>,
    %c0_23 = arith.constant 0 : index
    %c0_24 = arith.constant 0 : index
    %31 = vector.load %arg3[%c0_23, %c0_24] : memref<4x256xf32, #tpu.memory_space<vmem>>, vector<4x256xf32>
    %32 = vector.extract_strided_slice %31 {offsets = [0, 0], sizes = [1, 256], strides = [1, 1]} : vector<4x256xf32> to vector<1x256xf32>
    %33 = vector.broadcast %32 : vector<1x256xf32> to vector<8x256xf32>
    %34 = arith.mulf %14, %33 : vector<8x256xf32>
    %35 = vector.extract_strided_slice %31 {offsets = [1, 0], sizes = [1, 256], strides = [1, 1]} : vector<4x256xf32> to vector<1x256xf32>
    %36 = vector.broadcast %35 : vector<1x256xf32> to vector<8x256xf32>
    %37 = arith.mulf %16, %36 : vector<8x256xf32>
    %38 = arith.addf %34, %37 : vector<8x256xf32>
    %39 = vector.extract_strided_slice %31 {offsets = [2, 0], sizes = [1, 256], strides = [1, 1]} : vector<4x256xf32> to vector<1x256xf32>
    %40 = vector.broadcast %39 : vector<1x256xf32> to vector<8x256xf32>
    %41 = arith.mulf %18, %40 : vector<8x256xf32>
    %42 = arith.addf %38, %41 : vector<8x256xf32>
    %43 = vector.extract_strided_slice %31 {offsets = [3, 0], sizes = [1, 256], strides = [1, 1]} : vector<4x256xf32> to vector<1x256xf32>
    %44 = vector.broadcast %43 : vector<1x256xf32> to vector<8x256xf32>
    %45 = arith.mulf %12, %44 : vector<8x256xf32>
    %46 = arith.addf %42, %45 : vector<8x256xf32>
    %c0_25 = arith.constant 0 : index
    %c0_26 = arith.constant 0 : index
    %47 = vector.load %arg4[%c0_25, %c0_26] : memref<1x256xf32, #tpu.memory_space<vmem>>, vector<1x256xf32>
    %48 = vector.broadcast %47 : vector<1x256xf32> to vector<8x256xf32>
    %49 = arith.addf %46, %48 : vector<8x256xf32>
    %cst_27 = arith.constant 0.000000e+00 : f32
    %50 = vector.broadcast %cst_27 : f32 to vector<8x256xf32>
    %51 = arith.subf %50, %49 : vector<8x256xf32>
    %52 = math.exp %51 : vector<8x256xf32>
    %cst_28 = arith.constant 1.000000e+00 : f32
    %53 = vector.broadcast %cst_28 : f32 to vector<8x256xf32>
    %54 = arith.addf %53, %52 : vector<8x256xf32>
    %55 = tpu.reciprocal %54 {approx = true} : vector<8x256xf32> -> vector<8x256xf32>
    %56 = arith.mulf %49, %55 : vector<8x256xf32>
    %57 = arith.truncf %56 : vector<8x256xf32> to vector<8x256xbf16>
    %c0_29 = arith.constant 0 : index
    %c0_30 = arith.constant 0 : index
    %58 = vector.load %arg5[%c0_29, %c0_30] : memref<256x16xbf16, #tpu.memory_space<vmem>>, vector<256x16xbf16>
    %cst_31 = arith.constant dense<0.000000e+00> : vector<8x16xf32>
    %59 = tpu.matmul %57, %58, %cst_31 {dimension_numbers = #tpu.dot_dimension_numbers<[1], [0], [0], [1], [0, 0, 1, 1], [], []>} : vector<8x256xbf16>, vector<256x16xbf16>, vector<8x16xf32> -> vector<8x16xf32>
    %c0_32 = arith.constant 0 : index
    %c0_33 = arith.constant 0 : index
    %60 = vector.load %arg6[%c0_32, %c0_33] : memref<256x16xbf16, #tpu.memory_space<vmem>>, vector<256x16xbf16>
    %cst_34 = arith.constant dense<0.000000e+00> : vector<8x16xf32>
    %61 = tpu.matmul %57, %60, %cst_34 {dimension_numbers = #tpu.dot_dimension_numbers<[1], [0], [0], [1], [0, 0, 1, 1], [], []>} : vector<8x256xbf16>, vector<256x16xbf16>, vector<8x16xf32> -> vector<8x16xf32>
    %c0_35 = arith.constant 0 : index
    %c0_36 = arith.constant 0 : index
    %62 = vector.load %arg7[%c0_35, %c0_36] : memref<256x16xbf16, #tpu.memory_space<vmem>>, vector<256x16xbf16>
    %cst_37 = arith.constant dense<0.000000e+00> : vector<8x16xf32>
    %63 = tpu.matmul %57, %62, %cst_37 {dimension_numbers = #tpu.dot_dimension_numbers<[1], [0], [0], [1], [0, 0, 1, 1], [], []>} : vector<8x256xbf16>, vector<256x16xbf16>, vector<8x16xf32> -> vector<8x16xf32>
    %64 = arith.truncf %59 : vector<8x16xf32> to vector<8x16xbf16>
    %c0_38 = arith.constant 0 : index
    %c0_39 = arith.constant 0 : index
    %65 = vector.load %arg8[%c0_38, %c0_39] : memref<16x256xbf16, #tpu.memory_space<vmem>>, vector<16x256xbf16>
    %cst_40 = arith.constant dense<0.000000e+00> : vector<8x256xf32>
    %66 = tpu.matmul %64, %65, %cst_40 {dimension_numbers = #tpu.dot_dimension_numbers<[1], [0], [0], [1], [0, 0, 1, 1], [], []>} : vector<8x16xbf16>, vector<16x256xbf16>, vector<8x256xf32> -> vector<8x256xf32>
    %c0_41 = arith.constant 0 : index
    %c0_42 = arith.constant 0 : index
    %67 = vector.load %arg9[%c0_41, %c0_42] : memref<1x256xf32, #tpu.memory_space<vmem>>, vector<1x256xf32>
    %68 = vector.broadcast %67 : vector<1x256xf32> to vector<8x256xf32>
    %69 = arith.addf %66, %68 : vector<8x256xf32>
    %cst_43 = arith.constant 0.000000e+00 : f32
    %70 = vector.broadcast %cst_43 : f32 to vector<8x256xf32>
    %71 = arith.maximumf %69, %70 : vector<8x256xf32>
    %72 = math.absf %69 : vector<8x256xf32>
    %cst_44 = arith.constant 0.000000e+00 : f32
    %73 = vector.broadcast %cst_44 : f32 to vector<8x256xf32>
    %74 = arith.subf %73, %72 : vector<8x256xf32>
    %75 = math.exp %74 : vector<8x256xf32>
    %76 = math.log1p %75 : vector<8x256xf32>
    %77 = arith.addf %71, %76 : vector<8x256xf32>
    %78 = vector.shape_cast %77 : vector<8x256xf32> to vector<8x1x256xf32>
    %c0_45 = arith.constant 0 : index
    %c0_46 = arith.constant 0 : index
    %79 = vector.load %arg10[%c0_45, %c0_46] : memref<16x256xf32, #tpu.memory_space<vmem>>, vector<16x256xf32>
    %80 = vector.shape_cast %79 : vector<16x256xf32> to vector<1x16x256xf32>
    %81 = vector.broadcast %78 : vector<8x1x256xf32> to vector<8x16x256xf32>
    %82 = vector.broadcast %80 : vector<1x16x256xf32> to vector<8x16x256xf32>
    %83 = arith.mulf %81, %82 : vector<8x16x256xf32>
    %84 = math.exp %83 : vector<8x16x256xf32>
    %85 = arith.mulf %77, %56 : vector<8x256xf32>
    %86 = vector.shape_cast %85 : vector<8x256xf32> to vector<8x1x256xf32>
    %87 = vector.shape_cast %61 : vector<8x16xf32> to vector<8x16x1xf32>
    %88 = vector.broadcast %86 : vector<8x1x256xf32> to vector<8x16x256xf32>
    %89 = vector.broadcast %87 : vector<8x16x1xf32> to vector<8x16x256xf32>
    %90 = arith.mulf %88, %89 : vector<8x16x256xf32>
    %c0_47 = arith.constant 0 : index
    %c0_48 = arith.constant 0 : index
    %c0_49 = arith.constant 0 : index
    %91 = vector.load %arg12[%c0_47, %c0_48, %c0_49] : memref<8x16x256xf32, #tpu.memory_space<vmem>>, vector<8x16x256xf32>
    %92 = arith.mulf %84, %91 : vector<8x16x256xf32>
    %93 = arith.addf %92, %90 : vector<8x16x256xf32>
    %c0_50 = arith.constant 0 : index
    %c0_51 = arith.constant 0 : index
    %c0_52 = arith.constant 0 : index
    %94 = vector.load %arg16[%c0_50, %c0_51, %c0_52] : memref<8x16x256xf32, #tpu.memory_space<vmem>>, vector<8x16x256xf32>
    tpu.vector_store %arg16[%c0_50, %c0_51, %c0_52], %93 {strides = array<i32>} : memref<8x16x256xf32, #tpu.memory_space<vmem>>, vector<8x16x256xf32>,
    %95 = vector.shape_cast %63 : vector<8x16xf32> to vector<8x16x1xf32>
    %96 = vector.broadcast %95 : vector<8x16x1xf32> to vector<8x16x256xf32>
    %97 = arith.mulf %93, %96 : vector<8x16x256xf32>
    %cst_53 = arith.constant dense<0.000000e+00> : vector<8x256xf32>
    %98 = vector.multi_reduction <add>, %97, %cst_53 [1] : vector<8x16x256xf32> to vector<8x256xf32>
    %c0_54 = arith.constant 0 : index
    %c0_55 = arith.constant 0 : index
    %99 = vector.load %arg11[%c0_54, %c0_55] : memref<1x256xf32, #tpu.memory_space<vmem>>, vector<1x256xf32>
    %100 = vector.broadcast %99 : vector<1x256xf32> to vector<8x256xf32>
    %101 = arith.mulf %56, %100 : vector<8x256xf32>
    %102 = arith.addf %98, %101 : vector<8x256xf32>
    %103 = arith.mulf %102, %11 : vector<8x256xf32>
    %104 = arith.truncf %103 : vector<8x256xf32> to vector<8x256xbf16>
    %c0_56 = arith.constant 0 : index
    %c0_57 = arith.constant 0 : index
    %105 = vector.load %arg13[%c0_56, %c0_57] : memref<256x128xbf16, #tpu.memory_space<vmem>>, vector<256x128xbf16>
    %cst_58 = arith.constant dense<0.000000e+00> : vector<8x128xf32>
    %106 = tpu.matmul %104, %105, %cst_58 {dimension_numbers = #tpu.dot_dimension_numbers<[1], [0], [0], [1], [0, 0, 1, 1], [], []>} : vector<8x256xbf16>, vector<256x128xbf16>, vector<8x128xf32> -> vector<8x128xf32>
    %c0_59 = arith.constant 0 : index
    %c0_60 = arith.constant 0 : index
    %107 = vector.load %arg14[%c0_59, %c0_60] : memref<8x128xf32, #tpu.memory_space<vmem>>, vector<8x128xf32>
    tpu.vector_store %arg14[%c0_59, %c0_60], %106 {strides = array<i32>} : memref<8x128xf32, #tpu.memory_space<vmem>>, vector<8x128xf32>,
    return
  }
}

</mosaic_0001>

<bundles_post_ra>
// kernel: _mamba_block_decode.1
= control target key start
LH: loop header
LB: loop body
LE: loop exit
PB: predicated region body
PF: predicated region fallthrough
CT: control target
= control target key end

     0   :  { %s4161_s0 = inlined_call_operand.hbm [shape: f32[8,128], index: 0, kind: input, shape index: {}]   ;;  %s4162_s1 = inlined_call_operand.vmem [shape: bf16[128,512], index: 1, kind: input, shape index: {}]   ;;  %s4163_s2 = inlined_call_operand.hbm [shape: f32[4,8,256], index: 2, kind: input, shape index: {}, may-alias: {2,15}]   ;;  %s4164_s3 = inlined_call_operand.hbm [shape: f32[4,256], index: 3, kind: input, shape index: {}]   ;;  %s4165_s4 = inlined_call_operand.hbm [shape: f32[1,256], index: 4, kind: input, shape index: {}]   ;;  %s4166_s5 = inlined_call_operand.vmem [shape: bf16[256,16], index: 5, kind: input, shape index: {}]   ;;  %s4167_s6 = inlined_call_operand.vmem [shape: bf16[256,16], index: 6, kind: input, shape index: {}]   ;;  %s4168_s7 = inlined_call_operand.vmem [shape: bf16[256,16], index: 7, kind: input, shape index: {}]   ;;  %s4169_s8 = inlined_call_operand.vmem [shape: bf16[16,256], index: 8, kind: input, shape index: {}]   ;;  %s4170_s9 = inlined_call_operand.vmem [shape: f32[1,256], index: 9, kind: input, shape index: {}]   ;;  %s4171_s10 = inlined_call_operand.hbm [shape: f32[16,256], index: 10, kind: input, shape index: {}]   ;;  %s4172_s11 = inlined_call_operand.hbm [shape: f32[1,256], index: 11, kind: input, shape index: {}]   ;;  %s4173_s12 = inlined_call_operand.hbm [shape: f32[8,16,256], index: 12, kind: input, shape index: {}, may-alias: {12,16}]   ;;  %s4174_s13 = inlined_call_operand.vmem [shape: bf16[256,128], index: 13, kind: input, shape index: {}]   ;;  %s4175_s14 = inlined_call_operand.hbm [shape: f32[8,128], index: 14, kind: output, shape index: {0}]   ;;  %s4176_s15 = inlined_call_operand.hbm [shape: f32[4,8,256], index: 15, kind: output, shape index: {1}, may-alias: {2,15}]   ;;  %s4177_s16 = inlined_call_operand.hbm [shape: f32[8,16,256], index: 16, kind: output, shape index: {2}, may-alias: {12,16}]  }
   0x1   :  { %4196 = sst [smem:[#allocation35_spill]] %s4161_s0 }
   0x2   :  { %22 = vsyncpa [#allocation3], 0 }
   0x3   :  { %23 = vsyncpa [#allocation6], 0 }
   0x4   :  { %24 = vsyncpa [#allocation9], 0 }
   0x5   :  { %25 = vsyncpa [#allocation12], 0 }
   0x6   :  { %26 = vsyncpa [#allocation4], 0  ;;  %s45_s23 = sshll.u32 %s4163_s2, 4  ;;  %s46_s23 = int_to_ptr.hbm [resolvable:$true] %s45_s23 }
   0x7   :  { %27 = vsyncpa [#allocation16], 0  ;;  %s3021_s24 = smov [#allocation5]   ;;  %s70_s28 = sshll.u32 %s4165_s4, 4  ;;  %s71_s28 = int_to_ptr.hbm [resolvable:$true] %s70_s28 }
   0x8   :  { %s47_s25 = sshll.u32 %s3021_s24, 4  ;;  %s4178_s29 = smov 256   ;;  %s48_s25 = int_to_ptr.vmem [resolvable:$true] %s47_s25 }
   0x9   :  { %s3023_s30 = smov 16   ;;  %s3024_s0 = smov [#allocation8]  }
   0xa   :  { %53 = dma.hbm_to_vmem [thread:$0]  %s46_s23, 1024, %s48_s25, [#allocation6], %s4178_s29, %s4178_s29, %s3023_s30  }
   0xb   :  { %s72_s17 = sshll.u32 %s3024_s0, 4  ;;  %s104_s19 = sshll.u32 %s4172_s11, 4  ;;  %s73_s17 = int_to_ptr.vmem [resolvable:$true] %s72_s17  ;;  %s105_s19 = int_to_ptr.hbm [resolvable:$true] %s104_s19 }
   0xc   :  { %75 = dma.hbm_to_vmem [thread:$0]  %s71_s28, 32, %s73_s17, [#allocation9]  }
   0xd   :  { %s4197_s22 = sld [smem:[#allocation35_spill]]  ;;  %s3025_s24 = smov [#allocation11]  }
   0xe   :  { %s106_s26 = sshll.u32 %s3025_s24, 4  ;;  %s3026_s23 = smov [#allocation2]   ;;  %s107_s26 = int_to_ptr.vmem [resolvable:$true] %s106_s26 }
   0xf   :  { %109 = dma.hbm_to_vmem [thread:$0]  %s105_s19, 32, %s107_s26, [#allocation12]  }
  0x10   :  { %s35_s25 = sshll.u32 %s3026_s23, 4  ;;  %s59_s29 = sshll.u32 %s4164_s3, 4  ;;  %s36_s25 = int_to_ptr.vmem [resolvable:$true] %s35_s25  ;;  %s60_s29 = int_to_ptr.hbm [resolvable:$true] %s59_s29 }
  0x11   :  { %s90_s17 = sshll.u32 %s4171_s10, 4  ;;  %s3027_s18 = smov [#allocation7]   ;;  %s91_s17 = int_to_ptr.hbm [resolvable:$true] %s90_s17 }
  0x12   :  { %s61_s2 = sshll.u32 %s3027_s18, 4  ;;  %s3028_s20 = smov [#allocation10]   ;;  %s62_s2 = int_to_ptr.vmem [resolvable:$true] %s61_s2 }
  0x13   :  { %s33_s4 = sshll.u32 %s4197_s22, 4  ;;  %s92_s19 = sshll.u32 %s3028_s20, 4  ;;  %s34_s4 = int_to_ptr.hbm [resolvable:$true] %s33_s4  ;;  %s93_s19 = int_to_ptr.vmem [resolvable:$true] %s92_s19 }
  0x14   :  { %38 = dma.hbm_to_vmem [thread:$0]  %s34_s4, 128, %s36_s25, [#allocation3]  }
  0x15   :  { %64 = dma.hbm_to_vmem [thread:$0]  %s60_s29, 128, %s62_s2, [#allocation6]  }
  0x16   :  { %s114_s24 = sshll.u32 %s4173_s12, 4  ;;  %s4198_s3 = smov 256   ;;  %s115_s24 = int_to_ptr.hbm [resolvable:$true] %s114_s24 }
  0x17   :  { %98 = dma.hbm_to_vmem [thread:$0]  %s91_s17, 512, %s93_s19, [#allocation9], %s4198_s3, %s4198_s3, %s3023_s30  }
  0x18   :  { %s3029_s4 = smov [#allocation13]  }
  0x19   :  { %s116_s26 = sshll.u32 %s3029_s4, 4  ;;  %s117_s26 = int_to_ptr.vmem [resolvable:$true] %s116_s26 }
  0x1a   :  { %122 = dma.hbm_to_vmem [thread:$0]  %s115_s24, 4096, %s117_s26, [#allocation12], %s4198_s3, %s4198_s3, %s3023_s30  }
  0x1b   :  { %3009 = dma.done.wait [#allocation3], 128  }
  0x1c   :  { %3010 = vsyncadd [#allocation3], 4294967168 }
  0x1d   :  { %3011 = dma.done.wait [#allocation6], 1152  }
  0x1e   :  { %3012 = vsyncadd [#allocation6], 4294966144 }
  0x1f   :  { %3013 = dma.done.wait [#allocation9], 544  }
  0x20   :  { %3014 = vsyncadd [#allocation9], 4294966752 }
  0x21   :  { %3015 = dma.done.wait [#allocation12], 4128  }
  0x22   :  { %3016 = vsyncadd [#allocation12], 4294963168  ;;  %v2274_v0 = vld [vmem:[%s4162_s1 + $0xe8] sm:$0xf]  ;;  %v2577_v1 = vld [vmem:[%s4162_s1 + $0xf4] sm:$0xf0] }
  0x23   :  { %v2575_v2 = vld [vmem:[%s4162_s1 + $0xec] sm:$0xf]  ;;  %v2275_v3 = vor.u32 %v2577_v1, %v2274_v0  ;;  %v2276_v4 = vld [vmem:[%s4162_s1 + $0xf8] sm:$0xf0]  ;;  %v2258_v5 = vld [vmem:[%s4162_s1 + $0xc8] sm:$0xf] }
  0x24   :  { %v2573_v6 = vld [vmem:[%s4162_s1 + $0xd4] sm:$0xf0]  ;;  %v2279_v7 = vor.u32 %v2575_v2, %v2276_v4  ;;  %v2571_v8 = vld [vmem:[%s4162_s1 + $0xcc] sm:$0xf]  ;;  %v2260_v9 = vld [vmem:[%s4162_s1 + $0xd8] sm:$0xf0] }
  0x25   :  { %374 = vmatpush.bf16.msra.mxu2 %v2275_v3  ;;  %v2259_v10 = vor.u32 %v2573_v6, %v2258_v5  ;;  %v2263_v11 = vor.u32 %v2571_v8, %v2260_v9  ;;  %v2242_v12 = vld [vmem:[%s4162_s1 + $0xa8] sm:$0xf]  ;;  %v2569_v13 = vld [vmem:[%s4162_s1 + $0xb4] sm:$0xf0]  ;;  %v2567_v14 = vld [vmem:[%s4162_s1 + $0xac] sm:$0xf] }
  0x26   :  { %387 = vmatpush.bf16.msra.mxu3 %v2279_v7  ;;  %v2244_v15 = vld [vmem:[%s4162_s1 + $0xb8] sm:$0xf0]  ;;  %v2243_v16 = vor.u32 %v2569_v13, %v2242_v12  ;;  %v2226_v18 = vld [vmem:[%s4162_s1 + $0x88] sm:$0xf]  ;;  %v2565_v19 = vld [vmem:[%s4162_s1 + $0x94] sm:$0xf0] }
  0x27   :  { %v2247_v17 = vor.u32 %v2567_v14, %v2244_v15  ;;  %v2563_v20 = vld [vmem:[%s4162_s1 + $0x8c] sm:$0xf]  ;;  %v2228_v21 = vld [vmem:[%s4162_s1 + $0x98] sm:$0xf0]  ;;  %v2210_v22 = vld [vmem:[%s4162_s1 + $0x68] sm:$0xf]  ;;  %v2227_v24 = vor.u32 %v2565_v19, %v2226_v18 }
  0x28   :  { %v2561_v23 = vld [vmem:[%s4162_s1 + $0x74] sm:$0xf0]  ;;  %v2559_v25 = vld [vmem:[%s4162_s1 + $0x6c] sm:$0xf]  ;;  %v2266_v26 = vld [vmem:[%s4162_s1 + $0xe0] sm:$0xf]  ;;  %v2231_v29 = vor.u32 %v2563_v20, %v2228_v21 }
  0x29   :  { %375 = vmatpush.bf16.msra.mxu2 %v2259_v10  ;;  %v2576_v27 = vld [vmem:[%s4162_s1 + $0xec] sm:$0xf0]  ;;  %v2574_v28 = vld [vmem:[%s4162_s1 + $0xe4] sm:$0xf]  ;;  %v2268_v31 = vld [vmem:[%s4162_s1 + $0xf0] sm:$0xf0]  ;;  %v2211_v39 = vor.u32 %v2561_v23, %v2210_v22 }
  0x2a   :  { %388 = vmatpush.bf16.msra.mxu3 %v2263_v11  ;;  %v2267_v30 = vor.u32 %v2576_v27, %v2266_v26  ;;  %v2250_v32 = vld [vmem:[%s4162_s1 + $0xc0] sm:$0xf]  ;;  %v2572_v33 = vld [vmem:[%s4162_s1 + $0xcc] sm:$0xf0]  ;;  %v2212_v34 = vld [vmem:[%s4162_s1 + $0x78] sm:$0xf0]  ;;  %v2271_v35 = vor.u32 %v2574_v28, %v2268_v31 }
  0x2b   :  { %v2570_v36 = vld [vmem:[%s4162_s1 + $0xc4] sm:$0xf]  ;;  %v2252_v37 = vld [vmem:[%s4162_s1 + $0xd0] sm:$0xf0]  ;;  %v2251_v38 = vor.u32 %v2572_v33, %v2250_v32  ;;  %v2194_v40 = vld [vmem:[%s4162_s1 + $0x48] sm:$0xf]  ;;  %v2215_v44 = vor.u32 %v2559_v25, %v2212_v34 }
  0x2c   :  { %348 = vmatpush.bf16.msra.mxu0 %v2267_v30  ;;  %361 = vmatpush.bf16.msra.mxu1 %v2271_v35  ;;  %v2255_v41 = vor.u32 %v2570_v36, %v2252_v37  ;;  %v2234_v42 = vld [vmem:[%s4162_s1 + $0xa0] sm:$0xf]  ;;  %v2568_v43 = vld [vmem:[%s4162_s1 + $0xac] sm:$0xf0]  ;;  %v2557_v45 = vld [vmem:[%s4162_s1 + $0x54] sm:$0xf0] }
  0x2d   :  { %376 = vmatpush.bf16.msra.mxu2 %v2243_v16  ;;  %v2566_v46 = vld [vmem:[%s4162_s1 + $0xa4] sm:$0xf]  ;;  %v2236_v47 = vld [vmem:[%s4162_s1 + $0xb0] sm:$0xf0]  ;;  %v2555_v48 = vld [vmem:[%s4162_s1 + $0x4c] sm:$0xf]  ;;  %v2235_v50 = vor.u32 %v2568_v43, %v2234_v42  ;;  %v2195_v51 = vor.u32 %v2557_v45, %v2194_v40 }
  0x2e   :  { %389 = vmatpush.bf16.msra.mxu3 %v2247_v17  ;;  %v2196_v49 = vld [vmem:[%s4162_s1 + $0x58] sm:$0xf0]  ;;  %v2178_v52 = vld [vmem:[%s4162_s1 + $0x28] sm:$0xf]  ;;  %v2239_v53 = vor.u32 %v2566_v46, %v2236_v47  ;;  %v2218_v54 = vld [vmem:[%s4162_s1 + $0x80] sm:$0xf] }
  0x2f   :  { %v2564_v55 = vld [vmem:[%s4162_s1 + $0x8c] sm:$0xf0]  ;;  %v2199_v56 = vor.u32 %v2555_v48, %v2196_v49  ;;  %v2553_v57 = vld [vmem:[%s4162_s1 + $0x34] sm:$0xf0]  ;;  %v2562_v58 = vld [vmem:[%s4162_s1 + $0x84] sm:$0xf] }
  0x30   :  { %349 = vmatpush.bf16.msra.mxu0 %v2251_v38  ;;  %362 = vmatpush.bf16.msra.mxu1 %v2255_v41  ;;  %v2220_v59 = vld [vmem:[%s4162_s1 + $0x90] sm:$0xf0]  ;;  %v2551_v60 = vld [vmem:[%s4162_s1 + $0x2c] sm:$0xf]  ;;  %v2180_v61 = vld [vmem:[%s4162_s1 + $0x38] sm:$0xf0]  ;;  %v2219_v62 = vor.u32 %v2564_v55, %v2218_v54  ;;  %v2179_v63 = vor.u32 %v2553_v57, %v2178_v52 }
  0x31   :  { %377 = vmatpush.bf16.msra.mxu2 %v2227_v24  ;;  %v2162_v0 = vld [vmem:[%s4162_s1 + $0x8] sm:$0xf]  ;;  %v2223_v1 = vor.u32 %v2562_v58, %v2220_v59  ;;  %v2202_v2 = vld [vmem:[%s4162_s1 + $0x60] sm:$0xf]  ;;  %v2560_v3 = vld [vmem:[%s4162_s1 + $0x6c] sm:$0xf0]  ;;  %v2183_v4 = vor.u32 %v2551_v60, %v2180_v61 }
  0x32   :  { %390 = vmatpush.bf16.msra.mxu3 %v2231_v29  ;;  %v2549_v5 = vld [vmem:[%s4162_s1 + $0x14] sm:$0xf0]  ;;  %v2558_v6 = vld [vmem:[%s4162_s1 + $0x64] sm:$0xf]  ;;  %v2204_v7 = vld [vmem:[%s4162_s1 + $0x70] sm:$0xf0]  ;;  %v2203_v10 = vor.u32 %v2560_v3, %v2202_v2 }
  0x33   :  { %v2547_v8 = vld [vmem:[%s4162_s1 + $0xc] sm:$0xf]  ;;  %v2164_v9 = vld [vmem:[%s4162_s1 + $0x18] sm:$0xf0]  ;;  %v2163_v11 = vor.u32 %v2549_v5, %v2162_v0  ;;  %v154_v12 = vld [vmem:[#allocation2] sm:$0xff]  ;;  %v2207_v13 = vor.u32 %v2558_v6, %v2204_v7  ;;  %vm975_vm0 = vcmask 130048  }
  0x34   :  { %350 = vmatpush.bf16.msra.mxu0 %v2235_v50  ;;  %363 = vmatpush.bf16.msra.mxu1 %v2239_v53  ;;  %v2186_v14 = vld [vmem:[%s4162_s1 + $0x40] sm:$0xf]  ;;  %v2556_v15 = vld [vmem:[%s4162_s1 + $0x4c] sm:$0xf0]  ;;  %v2167_v16 = vor.u32 %v2547_v8, %v2164_v9  ;;  %v2554_v17 = vld [vmem:[%s4162_s1 + $0x44] sm:$0xf]  ;;  %v155_v19 = vpack.c.bf16 %v154_v12, %v154_v12 }
  0x35   :  { %378 = vmatpush.bf16.msra.mxu2 %v2211_v39  ;;  %v2188_v18 = vld [vmem:[%s4162_s1 + $0x50] sm:$0xf0]  ;;  %v2187_v20 = vor.u32 %v2556_v15, %v2186_v14  ;;  %v2170_v22 = vld [vmem:[%s4162_s1 + $0x20] sm:$0xf]  ;;  %v2552_v23 = vld [vmem:[%s4162_s1 + $0x2c] sm:$0xf0] }
  0x36   :  { %391 = vmatpush.bf16.msra.mxu3 %v2215_v44  ;;  %v2191_v21 = vor.u32 %v2554_v17, %v2188_v18  ;;  %v2550_v24 = vld [vmem:[%s4162_s1 + $0x24] sm:$0xf]  ;;  %v2172_v25 = vld [vmem:[%s4162_s1 + $0x30] sm:$0xf0]  ;;  %v2171_v26 = vor.u32 %v2552_v23, %v2170_v22  ;;  %v2154_v28 = vld [vmem:[%s4162_s1] sm:$0xf] }
  0x37   :  { %v2175_v27 = vor.u32 %v2550_v24, %v2172_v25  ;;  %v2548_v29 = vld [vmem:[%s4162_s1 + $0xc] sm:$0xf0]  ;;  %v2546_v30 = vld [vmem:[%s4162_s1 + $0x4] sm:$0xf]  ;;  %v2156_v31 = vld [vmem:[%s4162_s1 + $0x10] sm:$0xf0] }
  0x38   :  { %351 = vmatpush.bf16.msra.mxu0 %v2219_v62  ;;  %364 = vmatpush.bf16.msra.mxu1 %v2223_v1  ;;  %v2155_v32 = vor.u32 %v2548_v29, %v2154_v28  ;;  %v2159_v33 = vor.u32 %v2546_v30, %v2156_v31  ;;  %v2585_v34 = vld [vmem:[%s4166_s5 + $0x38] sm:$0xff]  ;;  %v2584_v36 = vld [vmem:[%s4166_s5 + $0x30] sm:$0xff]  ;;  %v2583_v38 = vld [vmem:[%s4166_s5 + $0x28] sm:$0xff]  ;;  %vm1040_vm3 = vcmask 1041409   ;;  %vm1043_vm4 = vcmask 1042434   ;;  %s2114_s1 = sshll.u32 %s4176_s15, 4  ;;  %s2115_s1 = int_to_ptr.hbm [resolvable:$true] %s2114_s1 }
  0x39   :  { %379 = vmatpush.bf16.msra.mxu2 %v2195_v51  ;;  %v2593_v35 = vld [vmem:[%s4166_s5 + $0x78] sm:$0xff]  ;;  %v2592_v37 = vld [vmem:[%s4166_s5 + $0x70] sm:$0xff]  ;;  %v2591_v39 = vld [vmem:[%s4166_s5 + $0x68] sm:$0xff]  ;;  %vm1046_vm5 = vcmask 1043459   ;;  %vm1052_vm6 = vcmask 1045509   ;;  %vm1049_vm7 = vcmask 1044484  }
  0x3a   :  { %392 = vmatpush.bf16.msra.mxu3 %v2199_v56  ;;  %v2582_v40 = vld [vmem:[%s4166_s5 + $0x20] sm:$0xff]  ;;  %v3364_v42 = vld [vmem:[#allocation5 + $0x10] sm:$0xff]  ;;  %v3366_v43 = vld [vmem:[#allocation5 + $0x20] sm:$0xff]  ;;  %vm1055_vm8 = vcmask 1046534   ;;  %vm1058_vm9 = vcmask 1046528   ;;  %vm1038_vm10 = vcmask 1040384  }
  0x3b   :  { %v2590_v41 = vld [vmem:[%s4166_s5 + $0x60] sm:$0xff]  ;;  %421 = vst [vmem:[#allocation15] sm:$0xff] %v3364_v42  ;;  %v3369_v44 = vld [vmem:[#allocation5 + $0x30] sm:$0xff]  ;;  %v3381_v48 = vld [vmem:[#allocation5 + $0x28] sm:$0xff]  ;;  %vm1954_vm11 = vcmask 1047559   ;;  %s3030_s12 = smov [#allocation15]  }
  0x3c   :  { %352 = vmatpush.bf16.msra.mxu0 %v2203_v10  ;;  %365 = vmatpush.bf16.msra.mxu1 %v2207_v13  ;;  %424 = vst [vmem:[#allocation15 + $0x10] sm:$0xff] %v3366_v43  ;;  %v2601_v45 = vld [vmem:[%s4167_s6 + $0x38] sm:$0xff]  ;;  %v3376_v46 = vld [vmem:[#allocation5 + $0x18] sm:$0xff]  ;;  %v2600_v52 = vld [vmem:[%s4167_s6 + $0x30] sm:$0xff]  ;;  %s2112_s29 = sshll.u32 %s3030_s12, 4  ;;  %s3031_s23 = smov [#allocation17]   ;;  %s2113_s29 = int_to_ptr.vmem [resolvable:$true] %s2112_s29 }
  0x3d   :  { %380 = vmatpush.bf16.msra.mxu2 %v2179_v63  ;;  %427 = vst [vmem:[#allocation15 + $0x20] sm:$0xff] %v3369_v44  ;;  %v2609_v47 = vld [vmem:[%s4167_s6 + $0x78] sm:$0xff]  ;;  %v3384_v49 = vld [vmem:[#allocation5 + $0x38] sm:$0xff]  ;;  %v2608_v53 = vld [vmem:[%s4167_s6 + $0x70] sm:$0xff]  ;;  %s2125_s25 = sshll.u32 %s3031_s23, 4  ;;  %s3032_s15 = smov [#allocation14]   ;;  %s2126_s25 = int_to_ptr.vmem [resolvable:$true] %s2125_s25 }
  0x3e   :  { %393 = vmatpush.bf16.msra.mxu3 %v2183_v4  ;;  %422 = vst [vmem:[#allocation15 + $0x8] sm:$0xff] %v3376_v46  ;;  %v2581_v50 = vld [vmem:[%s4166_s5 + $0x18] sm:$0xff]  ;;  %v2580_v54 = vld [vmem:[%s4166_s5 + $0x10] sm:$0xff]  ;;  %v2599_v56 = vld [vmem:[%s4167_s6 + $0x28] sm:$0xff]  ;;  %s2102_s11 = sshll.u32 %s3032_s15, 4  ;;  %s2104_s17 = sshll.u32 %s4175_s14, 4  ;;  %s2103_s11 = int_to_ptr.vmem [resolvable:$true] %s2102_s11  ;;  %s2105_s17 = int_to_ptr.hbm [resolvable:$true] %s2104_s17 }
  0x3f   :  { %425 = vst [vmem:[#allocation15 + $0x18] sm:$0xff] %v3381_v48  ;;  %v2589_v51 = vld [vmem:[%s4166_s5 + $0x58] sm:$0xff]  ;;  %v2588_v55 = vld [vmem:[%s4166_s5 + $0x50] sm:$0xff]  ;;  %v2607_v57 = vld [vmem:[%s4167_s6 + $0x68] sm:$0xff] }
  0x40   :  { %353 = vmatpush.bf16.msra.mxu0 %v2187_v20  ;;  %366 = vmatpush.bf16.msra.mxu1 %v2191_v21  ;;  %428 = vst [vmem:[#allocation15 + $0x28] sm:$0xff] %v3384_v49  ;;  %v2579_v58 = vld [vmem:[%s4166_s5 + $0x8] sm:$0xff]  ;;  %v2598_v60 = vld [vmem:[%s4167_s6 + $0x20] sm:$0xff]  ;;  %v2597_v3 = vld [vmem:[%s4167_s6 + $0x18] sm:$0xff] }
  0x41   :  { %381 = vmatpush.bf16.msra.mxu2 %v2163_v11  ;;  %v2587_v59 = vld [vmem:[%s4166_s5 + $0x48] sm:$0xff]  ;;  %v2606_v61 = vld [vmem:[%s4167_s6 + $0x60] sm:$0xff]  ;;  %v2605_v4 = vld [vmem:[%s4167_s6 + $0x58] sm:$0xff] }
  0x42   :  { %394 = vmatpush.bf16.msra.mxu3 %v2167_v16  ;;  %v432_v62 = vld [vmem:[#allocation7] sm:$0xff]  ;;  %v2578_v63 = vld [vmem:[%s4166_s5] sm:$0xff]  ;;  %v2617_v5 = vld [vmem:[%s4168_s7 + $0x38] sm:$0xff] }
  0x43   :  { %v2586_v0 = vld [vmem:[%s4166_s5 + $0x40] sm:$0xff]  ;;  %v434_v1 = vperm.slane %v432_v62, 0  ;;  %v442_v2 = vperm.slane %v432_v62, 1  ;;  %v435_v6 = vperm.slane %v432_v62, 4  ;;  %v443_v7 = vperm.slane %v432_v62, 5  ;;  %v2625_v8 = vld [vmem:[%s4168_s7 + $0x78] sm:$0xff] }
  0x44   :  { %382 = vmatmul.bf16.vlgmr.msra.gmra.mxu2 %v155_v19  ;;  %354 = vmatpush.bf16.msra.mxu0 %v2171_v26  ;;  %v452_v11 = vperm.slane %v432_v62, 2  ;;  %v2596_v12 = vld [vmem:[%s4167_s6 + $0x10] sm:$0xff]  ;;  %v453_v17 = vperm.slane %v432_v62, 6  ;;  %v2595_v22 = vld [vmem:[%s4167_s6 + $0x8] sm:$0xff]  ;;  %v462_v29 = vperm.slane %v432_v62, 3  ;;  %v463_v30 = vperm.slane %v432_v62, 7 }
  0x45   :  { %395 = vmatmul.bf16.vlgmr.msra.gmra.mxu3 %v155_v19  ;;  %367 = vmatpush.bf16.msra.mxu1 %v2175_v27  ;;  %v438_v9 = vperm.slane %v434_v1, 0  ;;  %v446_v10 = vperm.slane %v442_v2, 1  ;;  %v2604_v13 = vld [vmem:[%s4167_s6 + $0x50] sm:$0xff]  ;;  %v439_v15 = vperm.slane %v435_v6, 0  ;;  %v447_v16 = vperm.slane %v443_v7, 1  ;;  %v2603_v23 = vld [vmem:[%s4167_s6 + $0x48] sm:$0xff] }
  0x46   :  { %776 = vmatpush.bf16.msrb.mxu2 %v2601_v45  ;;  %789 = vmatpush.bf16.msrb.mxu3 %v2609_v47  ;;  %v2616_v14 = vld [vmem:[%s4168_s7 + $0x30] sm:$0xff]  ;;  %v456_v21 = vperm.slane %v452_v11, 2  ;;  %v2615_v24 = vld [vmem:[%s4168_s7 + $0x28] sm:$0xff]  ;;  %v457_v27 = vperm.slane %v453_v17, 2  ;;  %v2610_v2 = vld [vmem:[%s4168_s7] sm:$0xff] }
  0x47   :  { %v2624_v18 = vld [vmem:[%s4168_s7 + $0x70] sm:$0xff]  ;;  %v448_v20 = vmul.f32 %v446_v10, %v3366_v43  ;;  %v441_v25 = vmul.f32 %v439_v15, %v3376_v46  ;;  %v449_v26 = vmul.f32 %v447_v16, %v3381_v48  ;;  %v2623_v28 = vld [vmem:[%s4168_s7 + $0x68] sm:$0xff]  ;;  %v2613_v43 = vld [vmem:[%s4168_s7 + $0x18] sm:$0xff] }
  0x48   :  { %355 = vmatpush.bf16.msra.mxu0 %v2155_v32  ;;  %v458_v32 = vmul.f32 %v456_v21, %v3369_v44  ;;  %v2621_v44 = vld [vmem:[%s4168_s7 + $0x58] sm:$0xff]  ;;  %v1214_v21 = vlaneseq }
  0x49   :  { %368 = vmatpush.bf16.msra.mxu1 %v2159_v33  ;;  %v2594_v33 = vld [vmem:[%s4167_s6] sm:$0xff] }
  0x4a   :  { %777 = vmatpush.bf16.msrb.mxu2 %v2600_v52  ;;  %790 = vmatpush.bf16.msrb.mxu3 %v2608_v53  ;;  %v2612_v52 = vld [vmem:[%s4168_s7 + $0x10] sm:$0xff] }
  0x4b   :  { %356 = vmatmul.bf16.vlgmr.msra.gmra.mxu0 %v155_v19 }
  0x4c   :  { %622 = vmatpush.bf16.msrb.mxu0 %v2585_v34  ;;  %369 = vmatmul.bf16.vlgmr.msra.gmra.mxu1 %v155_v19  ;;  %v440_v19 = vmul.f32 %v438_v9, %v3364_v42  ;;  %v2602_v34 = vld [vmem:[%s4167_s6 + $0x40] sm:$0xff] }
  0x4d   :  { %635 = vmatpush.bf16.msrb.mxu1 %v2593_v35  ;;  %v451_v35 = vadd.f32 %v449_v26, %v441_v25  ;;  %v3532_v25 = vshrl.u32 %v1214_v21, 7 }
  0x4e   :  { %778 = vmatpush.bf16.msrb.mxu2 %v2599_v56  ;;  %791 = vmatpush.bf16.msrb.mxu3 %v2607_v57  ;;  %v450_v31 = vadd.f32 %v448_v20, %v440_v19  ;;  %v2627_v19 = vld [vmem:[%s4169_s8 + $0x4] sm:$0xf0]  ;;  %v2626_v20 = vld [vmem:[%s4169_s8 + $0x4] sm:$0xf] }
  0x4f   :  { %2660 = vset.pattern.permute.xlu2 %v3532_v25  ;;  %2658 = vset.pattern.permute.xlu1 %v3532_v25 }
  0x50   :  { %623 = vmatpush.bf16.msrb.mxu0 %v2584_v36  ;;  %v459_v36 = vmul.f32 %v457_v27, %v3384_v49  ;;  %v460_v42 = vadd.f32 %v458_v32, %v450_v31  ;;  %2656 = vset.pattern.permute.xlu0 %v3532_v25 }
  0x51   :  { %636 = vmatpush.bf16.msrb.mxu1 %v2592_v37  ;;  %v2614_v37 = vld [vmem:[%s4168_s7 + $0x20] sm:$0xff] }
  0x52   :  { %779 = vmatpush.bf16.msrb.mxu2 %v2598_v60  ;;  %792 = vmatpush.bf16.msrb.mxu3 %v2606_v61  ;;  %v461_v46 = vadd.f32 %v459_v36, %v451_v35  ;;  %v2619_v60 = vld [vmem:[%s4168_s7 + $0x48] sm:$0xff] }
  0x54   :  { %624 = vmatpush.bf16.msrb.mxu0 %v2583_v38  ;;  %v2622_v38 = vld [vmem:[%s4168_s7 + $0x60] sm:$0xff] }
  0x55   :  { %637 = vmatpush.bf16.msrb.mxu1 %v2591_v39  ;;  %v466_v39 = vperm.slane %v462_v29, 3 }
  0x56   :  { %780 = vmatpush.bf16.msrb.mxu2 %v2597_v3  ;;  %793 = vmatpush.bf16.msrb.mxu3 %v2605_v4  ;;  %v2618_v3 = vld [vmem:[%s4168_s7 + $0x40] sm:$0xff] }
  0x58   :  { %625 = vmatpush.bf16.msrb.mxu0 %v2582_v40  ;;  %v472_v40 = vld [vmem:[#allocation8] sm:$0x3] }
  0x59   :  { %638 = vmatpush.bf16.msrb.mxu1 %v2590_v41  ;;  %v467_v41 = vperm.slane %v463_v30, 3  ;;  %v474_v48 = vperm.slane %v472_v40, 0 }
  0x5a   :  { %781 = vmatpush.bf16.msrb.mxu2 %v2596_v12  ;;  %794 = vmatpush.bf16.msrb.mxu3 %v2604_v13 }
  0x5c   :  { %626 = vmatpush.bf16.msrb.mxu0 %v2581_v50 }
  0x5d   :  { %639 = vmatpush.bf16.msrb.mxu1 %v2589_v51  ;;  %v475_v51 = vperm.slane %v472_v40, 1 }
  0x5e   :  { %782 = vmatpush.bf16.msrb.mxu2 %v2595_v22  ;;  %795 = vmatpush.bf16.msrb.mxu3 %v2603_v23  ;;  %v2476_v23 = vld [vmem:[%s4169_s8 + $0x8] sm:$0xf0] }
  0x60   :  { %627 = vmatpush.bf16.msrb.mxu0 %v2580_v54  ;;  %v2620_v54 = vld [vmem:[%s4168_s7 + $0x50] sm:$0xff] }
  0x61   :  { %640 = vmatpush.bf16.msrb.mxu1 %v2588_v55 }
  0x62   :  { %783 = vmatpush.bf16.msrb.mxu2 %v2594_v33  ;;  %796 = vmatpush.bf16.msrb.mxu3 %v2602_v34 }
  0x64   :  { %628 = vmatpush.bf16.msrb.mxu0 %v2579_v58  ;;  %v2611_v58 = vld [vmem:[%s4168_s7 + $0x8] sm:$0xff]  ;;  %s2127_s7 = sshll.u32 %s4177_s16, 4  ;;  %s2128_s7 = int_to_ptr.hbm [resolvable:$true] %s2127_s7 }
  0x65   :  { %641 = vmatpush.bf16.msrb.mxu1 %v2587_v59 }
  0x68   :  { %629 = vmatpush.bf16.msrb.mxu0 %v2578_v63 }
  0x69   :  { %642 = vmatpush.bf16.msrb.mxu1 %v2586_v0 }
  0x6c   :  { %930 = vmatpush.bf16.msra.mxu0 %v2617_v5 }
  0x6d   :  { %943 = vmatpush.bf16.msra.mxu1 %v2625_v8 }
  0x70   :  { %931 = vmatpush.bf16.msra.mxu0 %v2616_v14 }
  0x71   :  { %944 = vmatpush.bf16.msra.mxu1 %v2624_v18  ;;  %v2474_v18 = vld [vmem:[%s4169_s8] sm:$0xf] }
  0x72   :  { %v2475_v22 = vor.u32 %v2627_v19, %v2474_v18 }
  0x74   :  { %932 = vmatpush.bf16.msra.mxu0 %v2615_v24  ;;  %v2479_v24 = vor.u32 %v2626_v20, %v2476_v23  ;;  %986 = vmatpush.bf16.msra.mxu2 %v2475_v22 }
  0x75   :  { %945 = vmatpush.bf16.msra.mxu1 %v2623_v28 }
  0x76   :  { %999 = vmatpush.bf16.msra.mxu3 %v2479_v24 }
  0x78   :  { %933 = vmatpush.bf16.msra.mxu0 %v2614_v37 }
  0x79   :  { %946 = vmatpush.bf16.msra.mxu1 %v2622_v38 }
  0x7c   :  { %934 = vmatpush.bf16.msra.mxu0 %v2613_v43 }
  0x7d   :  { %947 = vmatpush.bf16.msra.mxu1 %v2621_v44 }
  0x80   :  { %935 = vmatpush.bf16.msra.mxu0 %v2612_v52 }
  0x81   :  { %948 = vmatpush.bf16.msra.mxu1 %v2620_v54 }
  0x84   :  { %936 = vmatpush.bf16.msra.mxu0 %v2611_v58 }
  0x85   :  { %949 = vmatpush.bf16.msra.mxu1 %v2619_v60 }
  0x88   :  { %937 = vmatpush.bf16.msra.mxu0 %v2610_v2 }
  0x89   :  { %950 = vmatpush.bf16.msra.mxu1 %v2618_v3 }
  0xc7   :  { %v383_v45 = vpop.f32.mrf.mxu2 }
  0xc8   :  { %430 = vst [vmem:[#allocation15 + $0x30] sm:$0xff] %v383_v45  ;;  %v468_v47 = vmul.f32 %v466_v39, %v383_v45  ;;  %v396_v49 = vpop.f32.mrf.mxu3  ;;  %v3508_v4 = vpop.f32.mrf.mxu0 }
  0xc9   :  { %431 = vst [vmem:[#allocation15 + $0x38] sm:$0xff] %v396_v49  ;;  %v469_v50 = vmul.f32 %v467_v41, %v396_v49  ;;  %v3510_v5 = vpop.f32.mrf.mxu1  ;;  %v3538_v41 = vadd.s32 8, %v3532_v25 }
  0xca   :  { %v470_v53 = vadd.f32 %v468_v47, %v460_v42  ;;  %v401_v3 = vsub.f32 0.0, %v3510_v5  ;;  %2120 = dma.vmem_to_hbm [thread:$0]  %s2113_s29, 1024, %s2115_s1, [#allocation16], %s4198_s3, %s4198_s3, %s3023_s30  }
  0xcb   :  { %v471_v55 = vadd.f32 %v469_v50, %v461_v46 }
  0xcc   :  { %v478_v56 = vadd.f32 %v474_v48, %v470_v53 }
  0xcd   :  { %v479_v57 = vadd.f32 %v475_v51, %v471_v55 }
  0xce   :  { %v480_v59 = vsub.f32 0.0, %v478_v56 }
  0xcf   :  { %v481_v61 = vsub.f32 0.0, %v479_v57  ;;  %v385_v62 = vpop.f32.mrf.mxu2 }
  0xd0   :  { %v482_v63 = vmul.f32 1.442695, %v480_v59  ;;  %v398_v0 = vpop.f32.mrf.mxu3  ;;  %v359_v10 = vpop.f32.mrf.mxu0 }
  0xd1   :  { %v484_v1 = vmul.f32 1.442695, %v481_v61  ;;  %v372_v11 = vpop.f32.mrf.mxu1  ;;  %v400_v0 = vsub.f32 0.0, %v3508_v4 }
  0xd2   :  { %2681 = vpow2.f32 %v482_v63  ;;  %v404_v11 = vmul.f32 1.442695, %v401_v3 }
  0xd3   :  { %2683 = vpow2.f32 %v484_v1 }
  0xd8   :  { %v2682_v6 = vpop.eup %2681 }
  0xd9   :  { %v2684_v7 = vpop.eup %2683  ;;  %v486_v8 = vadd.f32 1.0, %v2682_v6 }
  0xda   :  { %v487_v9 = vadd.f32 1.0, %v2684_v7 }
  0xdb   :  { %2685 = vrcp.f32 %v486_v8  ;;  %v402_v8 = vmul.f32 1.442695, %v400_v0 }
  0xdc   :  { %2687 = vrcp.f32 %v487_v9 }
  0xe1   :  { %v2686_v12 = vpop.eup %2685 }
  0xe2   :  { %v2688_v13 = vpop.eup %2687  ;;  %v3512_v14 = vmul.f32 %v2686_v12, %v478_v56  ;;  %v959_v56 = vld [vmem:[%s4170_s9] sm:$0x3] }
  0xe3   :  { %v3514_v15 = vmul.f32 %v2688_v13, %v479_v57  ;;  %v961_v57 = vperm.slane %v959_v56, 0  ;;  %v962_v58 = vperm.slane %v959_v56, 1 }
  0xe4   :  { %v492_v16 = vpack.c.bf16 %v3512_v14, %v3512_v14 }
  0xe5   :  { %v493_v17 = vpack.c.bf16 %v3514_v15, %v3514_v15 }
  0xe6   :  { %630 = vmatmul.bf16.vlgmr.msrb.gmra.mxu0 %v492_v16  ;;  %784 = vmatmul.bf16.vlgmr.msrb.gmra.mxu2 %v492_v16 }
  0xe7   :  { %643 = vmatmul.bf16.vlgmr.msrb.gmra.mxu1 %v493_v17  ;;  %797 = vmatmul.bf16.vlgmr.msrb.gmra.mxu3 %v493_v17 }
  0xf6   :  { %938 = vmatmul.bf16.vlgmr.msra.gmra.mxu0 %v492_v16 }
  0xf7   :  { %951 = vmatmul.bf16.vlgmr.msra.gmra.mxu1 %v493_v17 }
 0x163   :  { %v631_v26 = vpop.f32.mrf.mxu0 }
 0x164   :  { %v644_v27 = vpop.f32.mrf.mxu1 }
 0x165   :  { %v645_v28 = vadd.f32 %v644_v27, %v631_v26 }
 0x167   :  { %v956_v29 = vpack.c.bf16 %v645_v28, %v645_v28 }
 0x169   :  { %2480 = vmatmul.msk.bf16.vlgmr.msra.gmra.mxu2 %vm975_vm0, %v956_v29  ;;  %2481 = vmatmul.msk.bf16.vlgmr.msra.gmra.mxu3 %vm975_vm0, %v956_v29  ;;  %v785_v30 = vpop.f32.mrf.mxu2  ;;  %v1757_v29 = vld [vmem:[#allocation11] sm:$0x3] }
 0x16a   :  { %v798_v31 = vpop.f32.mrf.mxu3 }
 0x16b   :  { %v799_v32 = vadd.f32 %v798_v31, %v785_v30  ;;  %v633_v33 = vpop.f32.mrf.mxu0 }
 0x16c   :  { %v646_v34 = vpop.f32.mrf.mxu1 }
 0x16d   :  { %v1239_v35 = vperm.slane %v799_v32, 2  ;;  %v1226_v36 = vperm.slane %v799_v32, 1  ;;  %v1213_v37 = vperm.slane %v799_v32, 0  ;;  %v1252_v45 = vperm.slane %v799_v32, 3 }
 0x16e   :  { %v1265_v46 = vperm.slane %v799_v32, 4  ;;  %v1304_v47 = vperm.slane %v799_v32, 7  ;;  %v1278_v48 = vperm.slane %v799_v32, 5  ;;  %v1291_v51 = vperm.slane %v799_v32, 6 }
 0x16f   :  { %1244 = vperm.xlu1 %2658, %v1239_v35   ;;  %1231 = vperm.xlu0 %2656, %v1226_v36  }
 0x170   :  { %1218 = vperm.xlu2 %2660, %v1213_v37  }
 0x171   :  { %v787_v38 = vpop.f32.mrf.mxu2 }
 0x172   :  { %v800_v39 = vpop.f32.mrf.mxu3 }
 0x173   :  { %v939_v40 = vpop.f32.mrf.mxu0  ;;  %v1760_v39 = vperm.slane %v1757_v29, 1 }
 0x174   :  { %v952_v42 = vpop.f32.mrf.mxu1 }
 0x175   :  { %v3549_v49 = vadd.f32 %v952_v42, %v939_v40 }
 0x177   :  { %2659 = vset.pattern.permute.xlu1 %v3538_v41  ;;  %2657 = vset.pattern.permute.xlu0 %v3538_v41  ;;  %v1522_v50 = vperm.slane %v3549_v49, 1  ;;  %v1548_v52 = vperm.slane %v3549_v49, 3  ;;  %v1587_v53 = vperm.slane %v3549_v49, 6  ;;  %v1535_v54 = vperm.slane %v3549_v49, 2 }
 0x178   :  { %2661 = vset.pattern.permute.xlu2 %v3538_v41  ;;  %v1509_v55 = vperm.slane %v3549_v49, 0  ;;  %v1561_v63 = vperm.slane %v3549_v49, 4  ;;  %v1574_v16 = vperm.slane %v3549_v49, 5 }
 0x17b   :  { %v941_v43 = vpop.f32.mrf.mxu0 }
 0x17c   :  { %v954_v44 = vpop.f32.mrf.mxu1 }
 0x17f   :  { %1250 = vperm.xlu1 %2659, %v1239_v35   ;;  %1237 = vperm.xlu0 %2657, %v1226_v36  }
 0x180   :  { %1224 = vperm.xlu2 %2661, %v1213_v37   ;;  %v1759_v37 = vperm.slane %v1757_v29, 0 }
 0x187   :  { %2662 = vset.pattern.permute.xlu1 %v3532_v25  ;;  %2663 = vset.pattern.permute.xlu0 %v3532_v25 }
 0x188   :  { %1263 = vperm.xlu2 %2661, %v1252_v45  }
 0x18f   :  { %1257 = vperm.xlu1 %2662, %v1252_v45   ;;  %1270 = vperm.xlu0 %2663, %v1265_v46  }
 0x190   :  { %2665 = vset.pattern.permute.xlu2 %v3532_v25 }
 0x197   :  { %2664 = vset.pattern.permute.xlu1 %v3538_v41  ;;  %1309 = vperm.xlu0 %2663, %v1304_v47  }
 0x198   :  { %1283 = vperm.xlu2 %2665, %v1278_v48  }
 0x19f   :  { %1276 = vperm.xlu1 %2664, %v1265_v46   ;;  %2670 = vset.pattern.permute.xlu0 %v3538_v41 }
 0x1a0   :  { %2667 = vset.pattern.permute.xlu2 %v3538_v41 }
 0x1a7   :  { %1289 = vperm.xlu1 %2664, %v1278_v48   ;;  %1533 = vperm.xlu0 %2670, %v1522_v50  }
 0x1a8   :  { %1302 = vperm.xlu2 %2667, %v1291_v51  }
 0x1af   :  { %2666 = vset.pattern.permute.xlu1 %v3532_v25  ;;  %1559 = vperm.xlu0 %2670, %v1548_v52  }
 0x1b0   :  { %2669 = vset.pattern.permute.xlu2 %v3532_v25 }
 0x1b7   :  { %1296 = vperm.xlu1 %2666, %v1291_v51   ;;  %2677 = vset.pattern.permute.xlu0 %v3532_v25 }
 0x1b8   :  { %1527 = vperm.xlu2 %2669, %v1522_v50  }
 0x1bf   :  { %2668 = vset.pattern.permute.xlu1 %v3538_v41  ;;  %1592 = vperm.xlu0 %2677, %v1587_v53  }
 0x1c0   :  { %2672 = vset.pattern.permute.xlu2 %v3538_v41 }
 0x1c7   :  { %1315 = vperm.xlu1 %2668, %v1304_v47   ;;  %2680 = vset.pattern.permute.xlu0 %v3538_v41 }
 0x1c8   :  { %1546 = vperm.xlu2 %2672, %v1535_v54  }
 0x1ca   :  { %v3582_v17 = vpop.permute.xlu2 %1218 }
 0x1cf   :  { %2671 = vset.pattern.permute.xlu1 %v3532_v25 }
 0x1d0   :  { %2673 = vset.pattern.permute.xlu2 %v3532_v25 }
 0x1d7   :  { %1540 = vperm.xlu1 %2671, %v1535_v54  }
 0x1d8   :  { %1514 = vperm.xlu2 %2673, %v1509_v55  }
 0x1da   :  { %v3587_v31 = vpop.permute.xlu2 %1224 }
 0x1db   :  { %4199 = vst [vmem:[#allocation24_spill] sm:$0xff] %v3587_v31 }
 0x1df   :  { %2674 = vset.pattern.permute.xlu1 %v3538_v41 }
 0x1e0   :  { %1553 = vperm.xlu2 %2673, %v1548_v52  }
 0x1e1   :  { %v3584_v27 = vpop.permute.xlu1 %1244 }
 0x1e7   :  { %1520 = vperm.xlu1 %2674, %v1509_v55   ;;  %v3599_v55 = vpop.permute.xlu0 %1231 }
 0x1e8   :  { %2676 = vset.pattern.permute.xlu2 %v3538_v41 }
 0x1ec   :  { %v988_v59 = vpop.f32.mrf.mxu2  ;;  %v1001_v60 = vpop.f32.mrf.mxu3 }
 0x1ed   :  { %v3571_v61 = vadd.f32 %v988_v59, %v961_v57  ;;  %v3573_v62 = vadd.f32 %v1001_v60, %v962_v58  ;;  %v3602_v57 = vmul.f32 %v1759_v37, %v3512_v14  ;;  %v3605_v58 = vmul.f32 %v1760_v39, %v3514_v15  ;;  %v3607_v59 = vpop.permute.xlu2 %1263 }
 0x1ef   :  { %v1007_v1 = vand.u32 2147483647, %v3571_v61  ;;  %v1008_v2 = vand.u32 2147483647, %v3573_v62  ;;  %2675 = vset.pattern.permute.xlu1 %v3532_v25  ;;  %v1005_v45 = vmax.f32 %v3571_v61, 0.0  ;;  %v1006_v47 = vmax.f32 %v3573_v62, 0.0 }
 0x1f0   :  { %1572 = vperm.xlu2 %2676, %v1561_v63  }
 0x1f1   :  { %v1009_v6 = vsub.f32 0.0, %v1007_v1  ;;  %v1010_v7 = vsub.f32 0.0, %v1008_v2  ;;  %v3592_v48 = vpop.permute.xlu1 %1250 }
 0x1f3   :  { %v1011_v9 = vmul.f32 1.442695, %v1009_v6  ;;  %v1013_v10 = vmul.f32 1.442695, %v1010_v7 }
 0x1f4   :  { %v990_v12 = vpop.f32.mrf.mxu2  ;;  %v1003_v13 = vpop.f32.mrf.mxu3 }
 0x1f5   :  { %2689 = vpow2.f32 %v1011_v9 }
 0x1f6   :  { %2691 = vpow2.f32 %v1013_v10  ;;  %v1238_v10 = vpop.permute.xlu0 %1237 }
 0x1f7   :  { %2693 = vpow2.f32 %v402_v8  ;;  %1566 = vperm.xlu1 %2675, %v1561_v63  }
 0x1f8   :  { %2695 = vpow2.f32 %v404_v11  ;;  %1585 = vperm.xlu2 %2676, %v1574_v16   ;;  %v1385_v11 = vld [vmem:[#allocation13 + $0x20] sm:$0xff] }
 0x1fb   :  { %v2690_v18 = vpop.eup %2689 }
 0x1fc   :  { %v2692_v19 = vpop.eup %2691  ;;  %v1015_v20 = vadd.f32 1.0, %v2690_v18  ;;  %v1018_v22 = vmul.f32 -0.5, %v2690_v18  ;;  %v1021_v33 = vand.u32 2147483647, %v2690_v18 }
 0x1fd   :  { %v2694_v21 = vpop.eup %2693  ;;  %v1024_v23 = vadd.f32 1.0, %v2692_v19  ;;  %v1027_v26 = vmul.f32 -0.5, %v2692_v19  ;;  %v1030_v35 = vand.u32 2147483647, %v2692_v19 }
 0x1fe   :  { %v2696_v24 = vpop.eup %2695  ;;  %2697 = vlog2.f32 %v1015_v20  ;;  %v406_v28 = vadd.f32 1.0, %v2694_v21  ;;  %v1019_v32 = vadd.f32 1.0, %v1018_v22  ;;  %vm1022_vm1 = vcmp.lt.f32.partialorder %v1021_v33, 0.0004427343 }
 0x1ff   :  { %2699 = vlog2.f32 %v1024_v23  ;;  %1579 = vperm.xlu1 %2675, %v1574_v16   ;;  %v407_v30 = vadd.f32 1.0, %v2696_v24  ;;  %v1028_v34 = vadd.f32 1.0, %v1027_v26  ;;  %vm1031_vm2 = vcmp.lt.f32.partialorder %v1030_v35, 0.0004427343 }
 0x200   :  { %2679 = vset.pattern.permute.xlu2 %v3532_v25  ;;  %2701 = vrcp.f32 %v406_v28  ;;  %v1020_v42 = vmul.f32 %v2690_v18, %v1019_v32  ;;  %v1600_v25 = vperm.slane %v3549_v49, 7 }
 0x201   :  { %2703 = vrcp.f32 %v407_v30  ;;  %v1029_v44 = vmul.f32 %v2692_v19, %v1028_v34  ;;  %v1258_v1 = vpop.permute.xlu1 %1257  ;;  %v3651_v19 = vpop.permute.xlu2 %1283 }
 0x202   :  { %4200 = vst [vmem:[#allocation25_spill] sm:$0xff] %v3651_v19 }
 0x204   :  { %v2698_v36 = vpop.eup %2697 }
 0x205   :  { %v2700_v38 = vpop.eup %2699  ;;  %v1017_v40 = vmul.f32 0.6931472, %v2698_v36 }
 0x206   :  { %v1026_v43 = vmul.f32 0.6931472, %v2700_v38  ;;  %v2702_v54 = vpop.eup %2701 }
 0x207   :  { %v1023_v46 = vsel %vm1022_vm1, %v1020_v42, %v1017_v40  ;;  %2678 = vset.pattern.permute.xlu1 %v3538_v41  ;;  %v2704_v56 = vpop.eup %2703  ;;  %v3619_v63 = vmul.f32 %v2702_v54, %v3508_v4 }
 0x208   :  { %v1032_v50 = vsel %vm1031_vm2, %v1029_v44, %v1026_v43  ;;  %1605 = vperm.xlu2 %2679, %v1600_v25   ;;  %v3597_v51 = vadd.f32 %v1023_v46, %v1005_v45  ;;  %v3622_v0 = vmul.f32 %v2704_v56, %v3510_v5  ;;  %v3685_v43 = vld [vmem:[#allocation10] sm:$0xff] }
 0x209   :  { %v1034_v52 = vadd.f32 %v1032_v50, %v1006_v47  ;;  %v3700_v50 = vpop.permute.xlu0 %1270 }
 0x20a   :  { %v3616_v62 = vmul.f32 %v3597_v51, %v3512_v14  ;;  %4203 = vst [vmem:[#allocation28_spill] sm:$0xff] %v3700_v50  ;;  %v1387_v50 = vld [vmem:[#allocation13 + $0x30] sm:$0xff] }
 0x20b   :  { %v1194_v41 = vmul.f32 %v1034_v52, %v3514_v15  ;;  %v3610_v60 = vrot.slane %v1034_v52, 7 }
 0x20d   :  { %v3612_v61 = vrot.slane %v1194_v41, 7  ;;  %v1041_v4 = vsel %vm1040_vm3, %v3597_v51, %v3610_v60  ;;  %v3649_v13 = vsel %vm1043_vm4, %v3597_v51, %v3610_v60  ;;  %v3661_v24 = vsel %vm1052_vm6, %v3597_v51, %v3610_v60 }
 0x20e   :  { %v1042_v16 = vrot.slane %v1041_v4, 1  ;;  %v1047_v26 = vsel %vm1046_vm5, %v3597_v51, %v3610_v60  ;;  %v1045_v28 = vrot.slane %v3649_v13, 2  ;;  %v3690_v44 = vsel %vm1049_vm7, %v3597_v51, %v3610_v60 }
 0x20f   :  { %v1201_v15 = vsel %vm1043_vm4, %v3616_v62, %v3612_v61  ;;  %1598 = vperm.xlu1 %2678, %v1587_v53   ;;  %v1199_v5 = vsel %vm1040_vm3, %v3616_v62, %v3612_v61  ;;  %v1203_v6 = vsel %vm1046_vm5, %v3616_v62, %v3612_v61  ;;  %v1207_v20 = vsel %vm1052_vm6, %v3616_v62, %v3612_v61 }
 0x210   :  { %v1202_v9 = vrot.slane %v1201_v15, 2  ;;  %v1200_v18 = vrot.slane %v1199_v5, 1  ;;  %v1204_v21 = vrot.slane %v1203_v6, 3  ;;  %v1208_v30 = vrot.slane %v1207_v20, 5  ;;  %v3720_v5 = vpop.permute.xlu2 %1302  ;;  %v3722_v6 = vld [vmem:[#allocation10 + $0x8] sm:$0xff] }
 0x211   :  { %v3672_v32 = vsel %vm1049_vm7, %v3616_v62, %v3612_v61  ;;  %v3676_v36 = vpop.permute.xlu1 %1276  ;;  %v1067_v37 = vperm.slane %v1042_v16, 0  ;;  %v1048_v39 = vrot.slane %v1047_v26, 3  ;;  %v1056_v49 = vsel %vm1055_vm8, %v3597_v51, %v3610_v60  ;;  %4204 = vst [vmem:[#allocation29_spill] sm:$0xff] %v3720_v5  ;;  %v3780_v38 = vpop.permute.xlu0 %1309 }
 0x212   :  { %v3667_v29 = vperm.slane %v1202_v9, 0  ;;  %v3674_v33 = vperm.slane %v1202_v9, 1  ;;  %v1319_v34 = vperm.slane %v1200_v18, 0  ;;  %v1320_v35 = vperm.slane %v1200_v18, 1  ;;  %4207 = vst [vmem:[#allocation32_spill] sm:$0xff] %v3780_v38 }
 0x213   :  { %v3681_v40 = vperm.slane %v1204_v21, 0  ;;  %v3683_v42 = vperm.slane %v1204_v21, 1  ;;  %v1101_v45 = vmul.f32 %v1067_v37, %v3685_v43  ;;  %v3696_v46 = vperm.slane %v1208_v30, 0 }
 0x214   :  { %v3698_v47 = vperm.slane %v1208_v30, 1  ;;  %v4180_v52 = vrot.slane %v3672_v32, 4  ;;  %v3706_v54 = vsel %vm1055_vm8, %v3616_v62, %v3612_v61  ;;  %v3710_v56 = vmul.f32 %v3667_v29, %v3592_v48 }
 0x215   :  { %4201 = vst [vmem:[#allocation26_spill] sm:$0xff] %v3696_v46  ;;  %v3714_v41 = vmul.f32 %v3674_v33, %v3592_v48  ;;  %v3716_v15 = vmul.f32 %v1319_v34, %v1238_v10  ;;  %v3718_v4 = vmul.f32 %v1320_v35, %v1238_v10  ;;  %v3725_v9 = vmul.f32 %v3681_v40, %v1258_v1 }
 0x216   :  { %4202 = vst [vmem:[#allocation27_spill] sm:$0xff] %v3698_v47  ;;  %v3728_v13 = vmul.f32 %v3683_v42, %v1258_v1  ;;  %v1137_v18 = vmul.f32 1.442695, %v1101_v45  ;;  %v1057_v20 = vrot.slane %v1056_v49, 6  ;;  %v1210_v21 = vrot.slane %v3706_v54, 6  ;;  %v3747_v45 = vld [vmem:[#allocation10 + $0x10] sm:$0xff] }
 0x217   :  { %1611 = vperm.xlu1 %2678, %v1600_v25   ;;  %v1068_v25 = vperm.slane %v1042_v16, 1  ;;  %v3736_v10 = vsel %vm1058_vm9, %v3610_v60, %v3597_v51  ;;  %v3740_v26 = vperm.slane %v4180_v52, 0  ;;  %v3745_v1 = vsel %vm1058_vm9, %v3612_v61, %v3616_v62  ;;  %v3749_v49 = vld [vmem:[#allocation10 + $0x18] sm:$0xff] }
 0x218   :  { %2705 = vpow2.f32 %v1137_v18  ;;  %v1103_v54 = vmul.f32 %v1067_v37, %v3747_v45  ;;  %v3753_v7 = vperm.slane %v1048_v39, 0  ;;  %v3755_v23 = vperm.slane %v1048_v39, 1 }
 0x219   :  { %v1102_v16 = vmul.f32 %v1068_v25, %v3722_v6  ;;  %v1104_v8 = vmul.f32 %v1068_v25, %v3749_v49  ;;  %v1353_v22 = vmul.f32 %v1319_v34, %v3599_v55  ;;  %v1354_v53 = vmul.f32 %v1320_v35, %v3599_v55  ;;  %v1528_v35 = vpop.permute.xlu2 %1527 }
 0x21a   :  { %v3759_v3 = vperm.slane %v1045_v28, 0  ;;  %v1141_v18 = vmul.f32 1.442695, %v1103_v54  ;;  %v1111_v37 = vmul.f32 %v3753_v7, %v3747_v45  ;;  %v1112_v25 = vmul.f32 %v3755_v23, %v3749_v49 }
 0x21b   :  { %v1139_v30 = vmul.f32 1.442695, %v1102_v16  ;;  %v3761_v16 = vpop.permute.xlu1 %1289  ;;  %v1143_v12 = vmul.f32 1.442695, %v1104_v8  ;;  %v3767_v39 = vperm.slane %v1045_v28, 1  ;;  %v3773_v55 = vperm.slane %v1057_v20, 1 }
 0x21c   :  { %v1107_v34 = vmul.f32 %v3759_v3, %v3747_v45  ;;  %v1157_v54 = vmul.f32 1.442695, %v1111_v37  ;;  %v1159_v8 = vmul.f32 1.442695, %v1112_v25  ;;  %v3778_v14 = vsel %vm1038_vm10, %v3597_v51, %v3610_v60  ;;  %v1386_v28 = vld [vmem:[#allocation13 + $0x28] sm:$0xff] }
 0x21d   :  { %2707 = vpow2.f32 %v1139_v30  ;;  %v3771_v30 = vperm.slane %v1057_v20, 0  ;;  %4206 = vst [vmem:[#allocation31_spill] sm:$0xff] %v3773_v55  ;;  %v1108_v48 = vmul.f32 %v3767_v39, %v3749_v49  ;;  %v1122_v37 = vmul.f32 %v3773_v55, %v3722_v6 }
 0x21e   :  { %2709 = vpow2.f32 %v1141_v18  ;;  %v2706_v2 = vpop.eup %2705  ;;  %v1149_v52 = vmul.f32 1.442695, %v1107_v34  ;;  %v4187_v51 = vperm.slane %v3778_v14, 0  ;;  %v3790_v31 = vperm.slane %v1210_v21, 0 }
 0x21f   :  { %4205 = vst [vmem:[#allocation30_spill] sm:$0xff] %v3771_v30  ;;  %2711 = vpow2.f32 %v1143_v12  ;;  %v1121_v20 = vmul.f32 %v3771_v30, %v3685_v43  ;;  %v1417_v18 = vmul.f32 %v2706_v2, %v1385_v11  ;;  %v1151_v25 = vmul.f32 1.442695, %v1108_v48  ;;  %v1388_v2 = vld [vmem:[#allocation13 + $0x38] sm:$0xff] }
 0x220   :  { %2713 = vpow2.f32 %v1157_v54  ;;  %v4186_v12 = vperm.slane %v3778_v14, 1  ;;  %v1179_v34 = vmul.f32 1.442695, %v1122_v37  ;;  %4208 = vst [vmem:[#allocation33_spill] sm:$0xff] %v3790_v31  ;;  %v1097_v11 = vmul.f32 %v4187_v51, %v3685_v43 }
 0x221   :  { %2715 = vpow2.f32 %v1159_v8  ;;  %v1177_v5 = vmul.f32 1.442695, %v1121_v20  ;;  %v1449_v38 = vadd.f32 %v1417_v18, %v1353_v22  ;;  %v3798_v8 = vperm.slane %v1210_v21, 1 }
 0x222   :  { %2717 = vpow2.f32 %v1149_v52  ;;  %v1098_v48 = vmul.f32 %v4186_v12, %v3722_v6  ;;  %v1363_v22 = vmul.f32 %v3681_v40, %v3607_v59  ;;  %v1395_v52 = vld [vmem:[#allocation13 + $0x70] sm:$0xff]  ;;  %v3807_v21 = vsel %vm1038_vm10, %v3616_v62, %v3612_v61  ;;  %v3809_v51 = vpop.permute.xlu2 %1546 }
 0x223   :  { %v2708_v60 = vpop.eup %2707  ;;  %2719 = vpow2.f32 %v1151_v25  ;;  %1481 = vst [vmem:[#allocation17 + $0x20] sm:$0xff] %v1449_v38  ;;  %v1396_v25 = vld [vmem:[#allocation13 + $0x78] sm:$0xff]  ;;  %v1391_v40 = vld [vmem:[#allocation13 + $0x50] sm:$0xff] }
 0x224   :  { %v1418_v19 = vmul.f32 %v2708_v60, %v1386_v28  ;;  %v2710_v54 = vpop.eup %2709  ;;  %2721 = vpow2.f32 %v1177_v5  ;;  %v1364_v60 = vmul.f32 %v3683_v42, %v3607_v59  ;;  %4209 = vst [vmem:[#allocation34_spill] sm:$0xff] %v3809_v51  ;;  %v1129_v5 = vmul.f32 1.442695, %v1097_v11  ;;  %v1534_v59 = vpop.permute.xlu0 %1533 }
 0x225   :  { %v2712_v18 = vpop.eup %2711  ;;  %v1419_v37 = vmul.f32 %v2710_v54, %v1387_v50  ;;  %2723 = vpow2.f32 %v1179_v34  ;;  %v1131_v55 = vmul.f32 1.442695, %v1098_v48  ;;  %v1392_v34 = vld [vmem:[#allocation13 + $0x58] sm:$0xff] }
 0x226   :  { %v1450_v28 = vadd.f32 %v1418_v19, %v1354_v53  ;;  %v2714_v53 = vpop.eup %2713  ;;  %v1617_v19 = vmul.f32 %v1528_v35, %v1449_v38  ;;  %v1420_v12 = vmul.f32 %v2712_v18, %v1388_v2  ;;  %v1405_v18 = vld [vmem:[#allocation13 + $0xc0] sm:$0xff]  ;;  %2725 = vpow2.f32 %v1129_v5 }
 0x227   :  { %v2716_v50 = vpop.eup %2715  ;;  %v1451_v54 = vadd.f32 %v1419_v37, %v3716_v15  ;;  %v1427_v42 = vmul.f32 %v2714_v53, %v1395_v52  ;;  %v1406_v15 = vld [vmem:[#allocation13 + $0xc8] sm:$0xff]  ;;  %2727 = vpow2.f32 %v1131_v55 }
 0x228   :  { %1482 = vst [vmem:[#allocation17 + $0x28] sm:$0xff] %v1450_v28  ;;  %v2718_v62 = vpop.eup %2717  ;;  %v1618_v47 = vmul.f32 %v1528_v35, %v1450_v28  ;;  %v1452_v38 = vadd.f32 %v1420_v12, %v3718_v4  ;;  %v1428_v2 = vmul.f32 %v2716_v50, %v1396_v25  ;;  %v1109_v35 = vmul.f32 %v3753_v7, %v3685_v43 }
 0x229   :  { %v1297_v20 = vpop.permute.xlu1 %1296  ;;  %v2720_v51 = vpop.eup %2719  ;;  %1483 = vst [vmem:[#allocation17 + $0x30] sm:$0xff] %v1451_v54  ;;  %v1619_v11 = vmul.f32 %v1534_v59, %v1451_v54  ;;  %v1459_v48 = vadd.f32 %v1427_v42, %v1363_v22  ;;  %v1423_v46 = vmul.f32 %v2718_v62, %v1391_v40  ;;  %v1317_v22 = vperm.slane %v3807_v21, 0 }
 0x22a   :  { %v1373_v30 = vmul.f32 %v3790_v31, %v1297_v20  ;;  %v1374_v61 = vmul.f32 %v3798_v8, %v1297_v20  ;;  %v2722_v52 = vpop.eup %2721  ;;  %1484 = vst [vmem:[#allocation17 + $0x38] sm:$0xff] %v1452_v38  ;;  %v1620_v37 = vmul.f32 %v1534_v59, %v1452_v38  ;;  %v1460_v53 = vadd.f32 %v1428_v2, %v1364_v60  ;;  %v1381_v60 = vld [vmem:[#allocation13] sm:$0xff] }
 0x22b   :  { %v1424_v31 = vmul.f32 %v2720_v51, %v1392_v34  ;;  %v2724_v28 = vpop.eup %2723  ;;  %v1659_v4 = vadd.f32 %v1619_v11, %v1617_v19  ;;  %1491 = vst [vmem:[#allocation17 + $0x70] sm:$0xff] %v1459_v48  ;;  %v3818_v12 = vadd.f32 %v1423_v46, %v3710_v56  ;;  %v1437_v20 = vmul.f32 %v2722_v52, %v1405_v18  ;;  %v1382_v56 = vld [vmem:[#allocation13 + $0x8] sm:$0xff] }
 0x22c   :  { %v1666_v25 = vadd.f32 %v1620_v37, %v1618_v47  ;;  %1492 = vst [vmem:[#allocation17 + $0x78] sm:$0xff] %v1460_v53  ;;  %v1438_v40 = vmul.f32 %v2724_v28, %v1406_v15  ;;  %v4195_v51 = vperm.slane %v3807_v21, 1  ;;  %v4210_v7 = vrot.slane %v3672_v32, 4  ;;  %v2726_v50 = vpop.eup %2725  ;;  %v1560_v18 = vpop.permute.xlu0 %1559 }
 0x22d   :  { %v3822_v55 = vadd.f32 %v1424_v31, %v3714_v41  ;;  %v1660_v19 = vrot.slane %v1659_v4, 4  ;;  %1487 = vst [vmem:[#allocation17 + $0x50] sm:$0xff] %v3818_v12  ;;  %v3830_v46 = vadd.f32 %v1437_v20, %v1373_v30  ;;  %v1110_v47 = vmul.f32 %v3755_v23, %v3722_v6  ;;  %v2728_v42 = vpop.eup %2727 }
 0x22e   :  { %v3827_v5 = vperm.slane %v4210_v7, 1  ;;  %v1060_v31 = vrot.slane %v3736_v10, 7  ;;  %v1667_v41 = vrot.slane %v1666_v25, 4  ;;  %v3836_v54 = vadd.f32 %v1438_v40, %v1374_v61 }
 0x22f   :  { %1488 = vst [vmem:[#allocation17 + $0x58] sm:$0xff] %v3822_v55  ;;  %v1153_v59 = vmul.f32 1.442695, %v1109_v35  ;;  %v1661_v34 = vadd.f32 %v1660_v19, %v1659_v4  ;;  %v1349_v30 = vmul.f32 %v1317_v22, %v3582_v17  ;;  %v1413_v23 = vmul.f32 %v2726_v50, %v1381_v60  ;;  %v1394_v50 = vld [vmem:[#allocation13 + $0x68] sm:$0xff] }
 0x230   :  { %1501 = vst [vmem:[#allocation17 + $0xc0] sm:$0xff] %v3830_v46  ;;  %v1155_v62 = vmul.f32 1.442695, %v1110_v47  ;;  %v1668_v38 = vadd.f32 %v1667_v41, %v1666_v25  ;;  %v1350_v10 = vmul.f32 %v4195_v51, %v3582_v17  ;;  %v1414_v61 = vmul.f32 %v2728_v42, %v1382_v56 }
 0x231   :  { %1502 = vst [vmem:[#allocation17 + $0xc8] sm:$0xff] %v3836_v54  ;;  %2729 = vpow2.f32 %v1153_v59  ;;  %v1662_v2 = vrot.slane %v1661_v34, 2  ;;  %v3848_v11 = vadd.f32 %v1413_v23, %v1349_v30  ;;  %v1105_v15 = vmul.f32 %v3759_v3, %v3685_v43  ;;  %v1393_v3 = vld [vmem:[#allocation13 + $0x60] sm:$0xff] }
 0x232   :  { %v3838_v32 = vpop.permute.xlu2 %1514  ;;  %2731 = vpow2.f32 %v1155_v62  ;;  %v4194_v52 = vrot.slane %v3745_v1, 7  ;;  %v1669_v37 = vrot.slane %v1668_v38, 2  ;;  %v3853_v35 = vadd.f32 %v1414_v61, %v1350_v10 }
 0x233   :  { %v1106_v28 = vmul.f32 %v3767_v39, %v3722_v6  ;;  %v3857_v4 = vperm.slane %v1060_v31, 0  ;;  %v3859_v17 = vperm.slane %v1060_v31, 1  ;;  %v1663_v20 = vadd.f32 %v1662_v2, %v1661_v34  ;;  %1477 = vst [vmem:[#allocation17] sm:$0xff] %v3848_v11 }
 0x234   :  { %v1145_v25 = vmul.f32 1.442695, %v1105_v15  ;;  %v1670_v40 = vadd.f32 %v1669_v37, %v1668_v38  ;;  %v1627_v60 = vmul.f32 %v1560_v18, %v1459_v48  ;;  %1478 = vst [vmem:[#allocation17 + $0x8] sm:$0xff] %v3853_v35  ;;  %v4211_v19 = vrot.slane %v3690_v44, 4 }
 0x235   :  { %v1147_v7 = vmul.f32 1.442695, %v1106_v28  ;;  %v1664_v47 = vrot.slane %v1663_v20, 1  ;;  %v1628_v39 = vmul.f32 %v1560_v18, %v1460_v53  ;;  %v1357_v31 = vmul.f32 %v3667_v29, %v3584_v27 }
 0x236   :  { %v3865_v56 = vperm.slane %v4211_v19, 0  ;;  %2733 = vpow2.f32 %v1145_v25  ;;  %v1671_v59 = vrot.slane %v1670_v40, 1  ;;  %v4212_v48 = vmov %v4211_v19  ;;  %v1389_v25 = vld [vmem:[#allocation13 + $0x40] sm:$0xff] }
 0x237   :  { %v2730_v41 = vpop.eup %2729  ;;  %2735 = vpow2.f32 %v1147_v7  ;;  %v3871_v42 = vperm.slane %v4212_v48, 1  ;;  %v1665_v23 = vadd.f32 %v1664_v47, %v1663_v20  ;;  %v4213_v53 = vrot.slane %v3661_v24, 5  ;;  %v1390_v47 = vld [vmem:[#allocation13 + $0x48] sm:$0xff] }
 0x238   :  { %v1115_v34 = vmul.f32 %v3865_v56, %v3747_v45  ;;  %v2732_v30 = vpop.eup %2731  ;;  %v1425_v62 = vmul.f32 %v2730_v41, %v1393_v3  ;;  %v1672_v61 = vadd.f32 %v1671_v59, %v1670_v40  ;;  %v4215_v37 = vrot.slane %v3602_v57, 1 }
 0x239   :  { %v3877_v38 = vperm.slane %v4213_v53, 0  ;;  %v4214_v10 = vmov %v4213_v53  ;;  %v1426_v2 = vmul.f32 %v2732_v30, %v1394_v50  ;;  %v1116_v44 = vmul.f32 %v3871_v42, %v3749_v49 }
 0x23a   :  { %v3881_v29 = vperm.slane %v4214_v10, 1  ;;  %v1554_v18 = vpop.permute.xlu2 %1553  ;;  %v1165_v15 = vmul.f32 1.442695, %v1115_v34  ;;  %v1799_v28 = vadd.f32 %v4215_v37, %v1665_v23  ;;  %v1457_v20 = vadd.f32 %v1425_v62, %v3725_v9  ;;  %v3903_v10 = vpop.permute.xlu1 %1315 }
 0x23b   :  { %v1119_v3 = vmul.f32 %v3877_v38, %v3747_v45  ;;  %v4216_v40 = vrot.slane %v3605_v58, 1  ;;  %v1458_v19 = vadd.f32 %v1426_v2, %v3728_v13  ;;  %v1167_v50 = vmul.f32 1.442695, %v1116_v44 }
 0x23c   :  { %v1120_v24 = vmul.f32 %v3881_v29, %v3749_v49  ;;  %2737 = vpow2.f32 %v1165_v15  ;;  %v2734_v41 = vpop.eup %2733  ;;  %v4217_v59 = vrot.slane %v3619_v63, 1  ;;  %1489 = vst [vmem:[#allocation17 + $0x60] sm:$0xff] %v1457_v20  ;;  %v1625_v9 = vmul.f32 %v1554_v18, %v1457_v20 }
 0x23d   :  { %v1800_v7 = vadd.f32 %v4216_v40, %v1672_v61  ;;  %v1173_v34 = vmul.f32 1.442695, %v1119_v3  ;;  %v2736_v23 = vpop.eup %2735  ;;  %v4218_v62 = vrot.slane %v3622_v0, 1  ;;  %1490 = vst [vmem:[#allocation17 + $0x68] sm:$0xff] %v1458_v19  ;;  %v1626_v13 = vmul.f32 %v1554_v18, %v1458_v19  ;;  %v1399_v3 = vld [vmem:[#allocation13 + $0x90] sm:$0xff] }
 0x23e   :  { %v3897_v48 = vmul.f32 %v4217_v59, %v1799_v28  ;;  %v1175_v30 = vmul.f32 1.442695, %v1120_v24  ;;  %v1421_v61 = vmul.f32 %v2734_v41, %v1389_v25  ;;  %2739 = vpow2.f32 %v1167_v50  ;;  %v4222_v41 = vld [vmem:[#allocation27_spill] sm:$0xff] }
 0x23f   :  { %v3901_v53 = vmul.f32 %v4218_v62, %v1800_v7  ;;  %v1687_v2 = vadd.f32 %v1627_v60, %v1625_v9  ;;  %v1358_v44 = vmul.f32 %v3674_v33, %v3584_v27  ;;  %v1422_v15 = vmul.f32 %v2736_v23, %v1390_v47  ;;  %v4220_v7 = vld [vmem:[#allocation26_spill] sm:$0xff] }
 0x240   :  { %2741 = vpow2.f32 %v1173_v34  ;;  %v3909_v37 = vperm.slane %v4194_v52, 0  ;;  %v1694_v28 = vadd.f32 %v1628_v39, %v1626_v13  ;;  %v1453_v20 = vadd.f32 %v1421_v61, %v1357_v31  ;;  %v1400_v31 = vld [vmem:[#allocation13 + $0x98] sm:$0xff] }
 0x241   :  { %2743 = vpow2.f32 %v1175_v30  ;;  %v1367_v24 = vmul.f32 %v3740_v26, %v3676_v36  ;;  %v1688_v18 = vrot.slane %v1687_v2, 4  ;;  %v1454_v25 = vadd.f32 %v1422_v15, %v1358_v44  ;;  %v1403_v30 = vld [vmem:[#allocation13 + $0xb0] sm:$0xff] }
 0x242   :  { %v4219_v60 = vperm.slane %v3778_v14, 0  ;;  %v2738_v27 = vpop.eup %2737  ;;  %v1368_v33 = vmul.f32 %v3827_v5, %v3676_v36  ;;  %v1371_v19 = vmul.f32 %v4220_v7, %v3761_v16  ;;  %v1695_v39 = vrot.slane %v1694_v28, 4  ;;  %1485 = vst [vmem:[#allocation17 + $0x40] sm:$0xff] %v1453_v20  ;;  %v4223_v36 = vld [vmem:[#allocation34_spill] sm:$0xff] }
 0x243   :  { %v4221_v47 = vperm.slane %v3778_v14, 1  ;;  %v1372_v59 = vmul.f32 %v4222_v41, %v3761_v16  ;;  %v1689_v9 = vadd.f32 %v1688_v18, %v1687_v2  ;;  %1486 = vst [vmem:[#allocation17 + $0x48] sm:$0xff] %v1454_v25  ;;  %v1431_v34 = vmul.f32 %v2738_v27, %v1399_v3  ;;  %v1404_v16 = vld [vmem:[#allocation13 + $0xb8] sm:$0xff] }
 0x244   :  { %v1099_v40 = vmul.f32 %v4219_v60, %v3747_v45  ;;  %v2740_v62 = vpop.eup %2739  ;;  %v1623_v13 = vmul.f32 %v4223_v36, %v3818_v12  ;;  %v1624_v61 = vmul.f32 %v4223_v36, %v3822_v55  ;;  %v1696_v44 = vadd.f32 %v1695_v39, %v1694_v28 }
 0x245   :  { %v1100_v50 = vmul.f32 %v4221_v47, %v3749_v49  ;;  %v1690_v14 = vrot.slane %v1689_v9, 2  ;;  %v1432_v47 = vmul.f32 %v2740_v62, %v1400_v31  ;;  %v3929_v52 = vadd.f32 %v1431_v34, %v1367_v24 }
 0x246   :  { %v1133_v23 = vmul.f32 1.442695, %v1099_v40  ;;  %v2742_v60 = vpop.eup %2741  ;;  %v1697_v3 = vrot.slane %v1696_v44, 2  ;;  %v1125_v12 = vmul.f32 %v3857_v4, %v3685_v43 }
 0x247   :  { %v1135_v15 = vmul.f32 1.442695, %v1100_v50  ;;  %v2744_v2 = vpop.eup %2743  ;;  %v1435_v40 = vmul.f32 %v2742_v60, %v1403_v30  ;;  %v1691_v27 = vadd.f32 %v1690_v14, %v1689_v9  ;;  %v3933_v28 = vadd.f32 %v1432_v47, %v1368_v33  ;;  %1495 = vst [vmem:[#allocation17 + $0x90] sm:$0xff] %v3929_v52  ;;  %v4224_v50 = vld [vmem:[#allocation24_spill] sm:$0xff]  ;;  %v1383_v33 = vld [vmem:[#allocation13 + $0x10] sm:$0xff] }
 0x248   :  { %2745 = vpow2.f32 %v1133_v23  ;;  %v1698_v39 = vadd.f32 %v1697_v3, %v1696_v44  ;;  %v1436_v24 = vmul.f32 %v2744_v2, %v1404_v16  ;;  %v1351_v34 = vmul.f32 %v1317_v22, %v4224_v50 }
 0x249   :  { %v1541_v18 = vpop.permute.xlu1 %1540  ;;  %2747 = vpow2.f32 %v1135_v15  ;;  %v3936_v31 = vadd.f32 %v1435_v40, %v1371_v19  ;;  %v1692_v30 = vrot.slane %v1691_v27, 1  ;;  %1496 = vst [vmem:[#allocation17 + $0x98] sm:$0xff] %v3933_v28  ;;  %v1384_v19 = vld [vmem:[#allocation13 + $0x18] sm:$0xff]  ;;  %v1126_v44 = vmul.f32 %v3859_v17, %v3722_v6 }
 0x24a   :  { %v1621_v51 = vmul.f32 %v1541_v18, %v1453_v20  ;;  %v1622_v55 = vmul.f32 %v1541_v18, %v1454_v25  ;;  %v4225_v20 = vperm.slane %v3807_v21, 1  ;;  %v1699_v9 = vrot.slane %v1698_v39, 1 }
 0x24b   :  { %v3945_v36 = vadd.f32 %v1436_v24, %v1372_v59  ;;  %1499 = vst [vmem:[#allocation17 + $0xb0] sm:$0xff] %v3936_v31  ;;  %v1185_v22 = vmul.f32 1.442695, %v1125_v12  ;;  %v1113_v60 = vmul.f32 %v3865_v56, %v3685_v43  ;;  %v1187_v47 = vmul.f32 1.442695, %v1126_v44 }
 0x24c   :  { %v1673_v23 = vadd.f32 %v1623_v13, %v1621_v51  ;;  %v1680_v62 = vadd.f32 %v1624_v61, %v1622_v55  ;;  %v1352_v25 = vmul.f32 %v4225_v20, %v4224_v50  ;;  %v1693_v51 = vadd.f32 %v1692_v30, %v1691_v27 }
 0x24d   :  { %v1700_v14 = vadd.f32 %v1699_v9, %v1698_v39  ;;  %1500 = vst [vmem:[#allocation17 + $0xb8] sm:$0xff] %v3945_v36  ;;  %2749 = vpow2.f32 %v1185_v22  ;;  %v4226_v16 = vrot.slane %v3602_v57, 3  ;;  %v4227_v12 = vrot.slane %v3605_v58, 3 }
 0x24e   :  { %v2746_v15 = vpop.eup %2745  ;;  %v1674_v13 = vrot.slane %v1673_v23, 4  ;;  %v1681_v61 = vrot.slane %v1680_v62, 4  ;;  %2751 = vpow2.f32 %v1187_v47  ;;  %v1114_v56 = vmul.f32 %v3871_v42, %v3722_v6 }
 0x24f   :  { %v2748_v21 = vpop.eup %2747  ;;  %v1415_v59 = vmul.f32 %v2746_v15, %v1383_v33  ;;  %v1803_v2 = vadd.f32 %v4226_v16, %v1693_v51  ;;  %v1804_v27 = vadd.f32 %v4227_v12, %v1700_v14  ;;  %v4228_v39 = vrot.slane %v3619_v63, 3 }
 0x250   :  { %v1675_v3 = vadd.f32 %v1674_v13, %v1673_v23  ;;  %v1682_v18 = vadd.f32 %v1681_v61, %v1680_v62  ;;  %v1416_v40 = vmul.f32 %v2748_v21, %v1384_v19  ;;  %v4229_v33 = vrot.slane %v3745_v1, 7  ;;  %v1409_v19 = vld [vmem:[#allocation13 + $0xe0] sm:$0xff]  ;;  %v4231_v13 = vld [vmem:[#allocation28_spill] sm:$0xff] }
 0x251   :  { %v1447_v55 = vadd.f32 %v1415_v59, %v1351_v34  ;;  %v3961_v24 = vmul.f32 %v4228_v39, %v1803_v2  ;;  %v4230_v62 = vrot.slane %v3622_v0, 3  ;;  %v1817_v34 = vrot.slane %v3619_v63, 2  ;;  %v1410_v61 = vld [vmem:[#allocation13 + $0xe8] sm:$0xff]  ;;  %v4233_v39 = vld [vmem:[#allocation30_spill] sm:$0xff] }
 0x252   :  { %v1676_v50 = vrot.slane %v1675_v3, 2  ;;  %v1683_v30 = vrot.slane %v1682_v18, 2  ;;  %v1448_v20 = vadd.f32 %v1416_v40, %v1352_v25  ;;  %v3965_v23 = vperm.slane %v4229_v33, 1  ;;  %v4232_v59 = vld [vmem:[#allocation32_spill] sm:$0xff] }
 0x253   :  { %v3969_v9 = vmul.f32 %v4230_v62, %v1804_v27  ;;  %1479 = vst [vmem:[#allocation17 + $0x10] sm:$0xff] %v1447_v55  ;;  %v1161_v42 = vmul.f32 1.442695, %v1113_v60  ;;  %v1818_v44 = vrot.slane %v3622_v0, 2  ;;  %v1163_v51 = vmul.f32 1.442695, %v1114_v56  ;;  %v2750_v25 = vpop.eup %2749 }
 0x254   :  { %v1677_v22 = vadd.f32 %v1676_v50, %v1675_v3  ;;  %v1684_v15 = vadd.f32 %v1683_v30, %v1682_v18  ;;  %1480 = vst [vmem:[#allocation17 + $0x18] sm:$0xff] %v1448_v20  ;;  %v1365_v1 = vmul.f32 %v3740_v26, %v4231_v13  ;;  %v1117_v21 = vmul.f32 %v3877_v38, %v3685_v43  ;;  %v2752_v3 = vpop.eup %2751 }
 0x255   :  { %2753 = vpow2.f32 %v1161_v42  ;;  %v1118_v14 = vmul.f32 %v3881_v29, %v3722_v6  ;;  %v1377_v60 = vmul.f32 %v3909_v37, %v4232_v59  ;;  %v1441_v2 = vmul.f32 %v2750_v25, %v1409_v19 }
 0x256   :  { %v1678_v47 = vrot.slane %v1677_v22, 1  ;;  %v1685_v16 = vrot.slane %v1684_v15, 1  ;;  %v1378_v18 = vmul.f32 %v3965_v23, %v4232_v59  ;;  %2755 = vpow2.f32 %v1163_v51 }
 0x257   :  { %v1169_v26 = vmul.f32 1.442695, %v1117_v21  ;;  %v1171_v40 = vmul.f32 1.442695, %v1118_v14  ;;  %v1613_v12 = vmul.f32 %v3838_v32, %v3848_v11  ;;  %v1442_v27 = vmul.f32 %v2752_v3, %v1410_v61 }
 0x258   :  { %v1679_v43 = vadd.f32 %v1678_v47, %v1677_v22  ;;  %v1686_v38 = vadd.f32 %v1685_v16, %v1684_v15  ;;  %v1614_v6 = vmul.f32 %v3838_v32, %v3853_v35  ;;  %v3987_v56 = vadd.f32 %v1441_v2, %v1377_v60  ;;  %v1397_v22 = vld [vmem:[#allocation13 + $0x80] sm:$0xff]  ;;  %v1398_v60 = vld [vmem:[#allocation13 + $0x88] sm:$0xff] }
 0x259   :  { %v1521_v29 = vpop.permute.xlu1 %1520  ;;  %2757 = vpow2.f32 %v1169_v26  ;;  %v1123_v50 = vmul.f32 %v4233_v39, %v3747_v45  ;;  %v4234_v30 = vrot.slane %v3602_v57, 2  ;;  %v4235_v62 = vrot.slane %v3605_v58, 2  ;;  %v4236_v32 = vld [vmem:[#allocation31_spill] sm:$0xff] }
 0x25a   :  { %v1615_v11 = vmul.f32 %v1521_v29, %v1447_v55  ;;  %v1616_v42 = vmul.f32 %v1521_v29, %v1448_v20  ;;  %v3995_v51 = vadd.f32 %v1442_v27, %v1378_v18  ;;  %1505 = vst [vmem:[#allocation17 + $0xe0] sm:$0xff] %v3987_v56  ;;  %2759 = vpow2.f32 %v1171_v40  ;;  %v1401_v18 = vld [vmem:[#allocation13 + $0xa0] sm:$0xff]  ;;  %v1402_v29 = vld [vmem:[#allocation13 + $0xa8] sm:$0xff] }
 0x25b   :  { %v1801_v33 = vadd.f32 %v4234_v30, %v1679_v43  ;;  %v1802_v19 = vadd.f32 %v4235_v62, %v1686_v38  ;;  %v2754_v15 = vpop.eup %2753  ;;  %v1124_v35 = vmul.f32 %v4236_v32, %v3749_v49  ;;  %v1181_v25 = vmul.f32 1.442695, %v1123_v50  ;;  %v4237_v43 = vld [vmem:[#allocation25_spill] sm:$0xff] }
 0x25c   :  { %v1645_v14 = vadd.f32 %v1615_v11, %v1613_v12  ;;  %v1652_v59 = vadd.f32 %v1616_v42, %v1614_v6  ;;  %v2756_v55 = vpop.eup %2755  ;;  %1506 = vst [vmem:[#allocation17 + $0xe8] sm:$0xff] %v3995_v51  ;;  %v1429_v20 = vmul.f32 %v2754_v15, %v1397_v22  ;;  %v1127_v16 = vmul.f32 %v3857_v4, %v3747_v45  ;;  %v1408_v42 = vld [vmem:[#allocation13 + $0xd8] sm:$0xff] }
 0x25d   :  { %v4000_v61 = vmul.f32 %v1817_v34, %v1801_v33  ;;  %v4002_v21 = vmul.f32 %v1818_v44, %v1802_v19  ;;  %2761 = vpow2.f32 %v1181_v25  ;;  %v1183_v47 = vmul.f32 1.442695, %v1124_v35 }
 0x25e   :  { %v1366_v2 = vmul.f32 %v3827_v5, %v4231_v13  ;;  %v1646_v3 = vrot.slane %v1645_v14, 4  ;;  %v1653_v34 = vrot.slane %v1652_v59, 4  ;;  %v1430_v26 = vmul.f32 %v2756_v55, %v1398_v60  ;;  %v1407_v13 = vld [vmem:[#allocation13 + $0xd0] sm:$0xff] }
 0x25f   :  { %v2758_v44 = vpop.eup %2757  ;;  %v1461_v40 = vadd.f32 %v1429_v20, %v1365_v1  ;;  %2763 = vpow2.f32 %v1183_v47  ;;  %v1128_v12 = vmul.f32 %v3859_v17, %v3749_v49  ;;  %v1369_v38 = vmul.f32 %v4220_v7, %v4237_v43  ;;  %v4238_v49 = vld [vmem:[#allocation29_spill] sm:$0xff] }
 0x260   :  { %v1647_v27 = vadd.f32 %v1646_v3, %v1645_v14  ;;  %v1654_v6 = vadd.f32 %v1653_v34, %v1652_v59  ;;  %v2760_v45 = vpop.eup %2759  ;;  %v1462_v4 = vadd.f32 %v1430_v26, %v1366_v2  ;;  %v1433_v5 = vmul.f32 %v2758_v44, %v1401_v18  ;;  %v4239_v17 = vld [vmem:[#allocation33_spill] sm:$0xff] }
 0x261   :  { %1493 = vst [vmem:[#allocation17 + $0x80] sm:$0xff] %v1461_v40  ;;  %v1189_v39 = vmul.f32 1.442695, %v1127_v16  ;;  %v1191_v50 = vmul.f32 1.442695, %v1128_v12  ;;  %v1370_v62 = vmul.f32 %v4222_v41, %v4237_v43  ;;  %v1375_v19 = vmul.f32 %v4239_v17, %v4238_v49  ;;  %v1573_v41 = vpop.permute.xlu2 %1572  ;;  %v1411_v34 = vld [vmem:[#allocation13 + $0xf0] sm:$0xff] }
 0x262   :  { %v1648_v30 = vrot.slane %v1647_v27, 2  ;;  %v1655_v33 = vrot.slane %v1654_v6, 2  ;;  %1494 = vst [vmem:[#allocation17 + $0x88] sm:$0xff] %v1462_v4  ;;  %v1434_v7 = vmul.f32 %v2760_v45, %v1402_v29  ;;  %v4017_v11 = vadd.f32 %v1433_v5, %v1369_v38 }
 0x263   :  { %v2762_v1 = vpop.eup %2761  ;;  %2765 = vpow2.f32 %v1189_v39  ;;  %v1376_v25 = vmul.f32 %v3798_v8, %v4238_v49  ;;  %v1863_v47 = vpack.c.bf16 %v3897_v48, %v3897_v48  ;;  %v1864_v16 = vpack.c.bf16 %v3901_v53, %v3901_v53 }
 0x264   :  { %v1649_v22 = vadd.f32 %v1648_v30, %v1647_v27  ;;  %v1656_v15 = vadd.f32 %v1655_v33, %v1654_v6  ;;  %v1439_v32 = vmul.f32 %v2762_v1, %v1407_v13  ;;  %v1466_v14 = vadd.f32 %v1434_v7, %v1370_v62  ;;  %1497 = vst [vmem:[#allocation17 + $0xa0] sm:$0xff] %v4017_v11  ;;  %v1412_v6 = vld [vmem:[#allocation13 + $0xf8] sm:$0xff] }
 0x265   :  { %v2764_v35 = vpop.eup %2763  ;;  %2767 = vpow2.f32 %v1191_v50  ;;  %v1379_v18 = vmul.f32 %v3909_v37, %v3903_v10  ;;  %v1631_v44 = vmul.f32 %v1573_v41, %v3929_v52  ;;  %v1632_v26 = vmul.f32 %v1573_v41, %v3933_v28 }
 0x266   :  { %v1650_v59 = vrot.slane %v1649_v22, 1  ;;  %v1657_v60 = vrot.slane %v1656_v15, 1  ;;  %v1440_v55 = vmul.f32 %v2764_v35, %v1408_v42  ;;  %v4022_v20 = vadd.f32 %v1439_v32, %v1375_v19  ;;  %1498 = vst [vmem:[#allocation17 + $0xa8] sm:$0xff] %v1466_v14 }
 0x267   :  { %v1927_v45 = vunpack.c.l.b16 %v1863_v47  ;;  %v1928_v5 = vunpack.c.l.b16 %v1864_v16  ;;  %v1380_v37 = vmul.f32 %v3965_v23, %v3903_v10 }
 0x268   :  { %v1651_v2 = vadd.f32 %v1650_v59, %v1649_v22  ;;  %v1658_v3 = vadd.f32 %v1657_v60, %v1656_v15  ;;  %v4028_v8 = vadd.f32 %v1440_v55, %v1376_v25  ;;  %1503 = vst [vmem:[#allocation17 + $0xd0] sm:$0xff] %v4022_v20 }
 0x269   :  { %v1567_v12 = vpop.permute.xlu1 %1566  ;;  %v2766_v48 = vpop.eup %2765  ;;  %v1941_v49 = vrot.slane %v1927_v45, 7  ;;  %v1956_v17 = vrot.slane %v1928_v5, 7 }
 0x26a   :  { %v1797_v43 = vadd.f32 %v3602_v57, %v1651_v2  ;;  %v1798_v53 = vadd.f32 %v3605_v58, %v1658_v3  ;;  %v1629_v38 = vmul.f32 %v1567_v12, %v1461_v40  ;;  %v1630_v27 = vmul.f32 %v1567_v12, %v1462_v4  ;;  %1504 = vst [vmem:[#allocation17 + $0xd8] sm:$0xff] %v4028_v8  ;;  %v1586_v10 = vpop.permute.xlu2 %1585 }
 0x26b   :  { %v2768_v29 = vpop.eup %2767  ;;  %v1443_v52 = vmul.f32 %v2766_v48, %v1411_v34  ;;  %v1635_v59 = vmul.f32 %v1586_v10, %v3936_v31  ;;  %v1636_v60 = vmul.f32 %v1586_v10, %v3945_v36  ;;  %v1867_v12 = vpack.c.bf16 %v3961_v24, %v3961_v24 }
 0x26c   :  { %v1845_v28 = vmul.f32 %v1797_v43, %v3619_v63  ;;  %v1846_v13 = vmul.f32 %v1798_v53, %v3622_v0  ;;  %v1701_v39 = vadd.f32 %v1631_v44, %v1629_v38  ;;  %v1708_v50 = vadd.f32 %v1632_v26, %v1630_v27  ;;  %v2635_v53 = vld [vmem:[%s4174_s13 + $0x38] sm:$0xff] }
 0x26d   :  { %v1444_v30 = vmul.f32 %v2768_v29, %v1412_v6  ;;  %v4042_v33 = vadd.f32 %v1443_v52, %v1379_v18  ;;  %v1865_v18 = vpack.c.bf16 %v4000_v61, %v4000_v61  ;;  %v1773_v31 = vrot.slane %v3602_v57, 4  ;;  %v2643_v61 = vld [vmem:[%s4174_s13 + $0x78] sm:$0xff]  ;;  %2070 = vmatpush.bf16.msrb.mxu2 %v2635_v53 }
 0x26e   :  { %v1861_v40 = vpack.c.bf16 %v1845_v28, %v1845_v28  ;;  %v1862_v4 = vpack.c.bf16 %v1846_v13, %v1846_v13  ;;  %v1702_v1 = vrot.slane %v1701_v39, 4  ;;  %v1709_v62 = vrot.slane %v1708_v50, 4  ;;  %2083 = vmatpush.bf16.msrb.mxu3 %v2643_v61  ;;  %v1593_v13 = vpop.permute.xlu0 %1592 }
 0x26f   :  { %v4044_v19 = vadd.f32 %v1444_v30, %v1380_v37  ;;  %1507 = vst [vmem:[#allocation17 + $0xf0] sm:$0xff] %v4042_v33  ;;  %v1774_v36 = vrot.slane %v3605_v58, 4  ;;  %v1821_v38 = vrot.slane %v3619_v63, 4  ;;  %v1929_v6 = vunpack.c.l.b16 %v1865_v18 }
 0x270   :  { %v1925_v23 = vunpack.c.l.b16 %v1861_v40  ;;  %v1926_v7 = vunpack.c.l.b16 %v1862_v4  ;;  %v1703_v42 = vadd.f32 %v1702_v1, %v1701_v39  ;;  %v1710_v22 = vadd.f32 %v1709_v62, %v1708_v50 }
 0x271   :  { %v1580_v15 = vpop.permute.xlu1 %1579  ;;  %1508 = vst [vmem:[#allocation17 + $0xf8] sm:$0xff] %v4044_v19  ;;  %v1822_v29 = vrot.slane %v3622_v0, 4  ;;  %v1931_v37 = vunpack.c.l.b16 %v1867_v12  ;;  %v1866_v39 = vpack.c.bf16 %v4002_v21, %v4002_v21  ;;  %v1775_v40 = vrot.slane %v3602_v57, 5  ;;  %v2642_v21 = vld [vmem:[%s4174_s13 + $0x70] sm:$0xff] }
 0x272   :  { %v1942_v32 = vsel %vm1040_vm3, %v1941_v49, %v1925_v23  ;;  %v4050_v35 = vsel %vm1040_vm3, %v1956_v17, %v1926_v7  ;;  %v1704_v25 = vrot.slane %v1703_v42, 2  ;;  %v1711_v41 = vrot.slane %v1710_v22, 2  ;;  %v2634_v7 = vld [vmem:[%s4174_s13 + $0x30] sm:$0xff]  ;;  %2084 = vmatpush.bf16.msrb.mxu3 %v2642_v21 }
 0x273   :  { %v1633_v55 = vmul.f32 %v1580_v15, %v4017_v11  ;;  %v1634_v47 = vmul.f32 %v1580_v15, %v1466_v14  ;;  %v1776_v4 = vrot.slane %v3605_v58, 5  ;;  %v1868_v49 = vpack.c.bf16 %v3969_v9, %v3969_v9  ;;  %2071 = vmatpush.bf16.msrb.mxu2 %v2634_v7  ;;  %2133 = dma.vmem_to_hbm [thread:$0]  %s2126_s25, 4096, %s2128_s7, [#allocation16], %s4198_s3, %s4198_s3, %s3023_s30  }
 0x274   :  { %v1705_v16 = vadd.f32 %v1704_v25, %v1703_v42  ;;  %v1712_v2 = vadd.f32 %v1711_v41, %v1710_v22  ;;  %v1943_v17 = vrot.slane %v1929_v6, 6  ;;  %v1637_v42 = vmul.f32 %v1593_v13, %v3830_v46 }
 0x275   :  { %v1715_v3 = vadd.f32 %v1635_v59, %v1633_v55  ;;  %v1722_v34 = vadd.f32 %v1636_v60, %v1634_v47  ;;  %v1945_v22 = vrot.slane %v1931_v37, 5  ;;  %v1638_v41 = vmul.f32 %v1593_v13, %v3836_v54  ;;  %v2633_v60 = vld [vmem:[%s4174_s13 + $0x28] sm:$0xff] }
 0x276   :  { %v1706_v44 = vrot.slane %v1705_v16, 1  ;;  %v1713_v26 = vrot.slane %v1712_v2, 1  ;;  %v1930_v59 = vunpack.c.l.b16 %v1866_v39  ;;  %v2641_v55 = vld [vmem:[%s4174_s13 + $0x68] sm:$0xff]  ;;  %v1944_v47 = vsel %vm1043_vm4, %v1943_v17, %v1942_v32  ;;  %v2631_v39 = vld [vmem:[%s4174_s13 + $0x18] sm:$0xff] }
 0x277   :  { %v1716_v48 = vrot.slane %v1715_v3, 4  ;;  %v1723_v43 = vrot.slane %v1722_v34, 4  ;;  %v1946_v54 = vsel %vm1046_vm5, %v1945_v22, %v1944_v47  ;;  %v1823_v12 = vrot.slane %v3619_v63, 5  ;;  %2072 = vmatpush.bf16.msrb.mxu2 %v2633_v60  ;;  %2085 = vmatpush.bf16.msrb.mxu3 %v2641_v55 }
 0x278   :  { %v1707_v11 = vadd.f32 %v1706_v44, %v1705_v16  ;;  %v1714_v14 = vadd.f32 %v1713_v26, %v1712_v2  ;;  %v1958_v53 = vrot.slane %v1930_v59, 6  ;;  %v1777_v55 = vrot.slane %v3602_v57, 6 }
 0x279   :  { %v1717_v27 = vadd.f32 %v1716_v48, %v1715_v3  ;;  %v1724_v24 = vadd.f32 %v1723_v43, %v1722_v34  ;;  %v1932_v34 = vunpack.c.l.b16 %v1868_v49  ;;  %v1824_v48 = vrot.slane %v3622_v0, 5 }
 0x27a   :  { %v1805_v45 = vadd.f32 %v1773_v31, %v1707_v11  ;;  %v1806_v5 = vadd.f32 %v1774_v36, %v1714_v14  ;;  %v1606_v36 = vpop.permute.xlu2 %1605  ;;  %v2632_v14 = vld [vmem:[%s4174_s13 + $0x20] sm:$0xff]  ;;  %v1778_v47 = vrot.slane %v3605_v58, 6 }
 0x27b   :  { %v1718_v52 = vrot.slane %v1717_v27, 2  ;;  %v1725_v28 = vrot.slane %v1724_v24, 2  ;;  %2073 = vmatpush.bf16.msrb.mxu2 %v2632_v14  ;;  %v2628_v14 = vld [vmem:[%s4174_s13] sm:$0xff] }
 0x27c   :  { %v1853_v50 = vmul.f32 %v1821_v38, %v1805_v45  ;;  %v1854_v30 = vmul.f32 %v1822_v29, %v1806_v5  ;;  %v1641_v45 = vmul.f32 %v1606_v36, %v3987_v56 }
 0x27d   :  { %v1719_v1 = vadd.f32 %v1718_v52, %v1717_v27  ;;  %v1726_v62 = vadd.f32 %v1725_v28, %v1724_v24  ;;  %v1960_v24 = vrot.slane %v1932_v34, 5  ;;  %v1959_v52 = vsel %vm1043_vm4, %v1958_v53, %v4050_v35 }
 0x27e   :  { %v1869_v10 = vpack.c.bf16 %v1853_v50, %v1853_v50  ;;  %v1870_v23 = vpack.c.bf16 %v1854_v30, %v1854_v30  ;;  %v1642_v30 = vmul.f32 %v1606_v36, %v3995_v51  ;;  %v1825_v34 = vrot.slane %v3619_v63, 6 }
 0x27f   :  { %v1720_v15 = vrot.slane %v1719_v1, 1  ;;  %v1727_v25 = vrot.slane %v1726_v62, 1  ;;  %v1961_v50 = vsel %vm1046_vm5, %v1960_v24, %v1959_v52  ;;  %2074 = vmatpush.bf16.msrb.mxu2 %v2631_v39  ;;  %v1780_v24 = vrot.slane %v3605_v58, 7 }
 0x280   :  { %v1933_v9 = vunpack.c.l.b16 %v1869_v10  ;;  %v1934_v46 = vunpack.c.l.b16 %v1870_v23  ;;  %v1828_v52 = vrot.slane %v3622_v0, 7 }
 0x281   :  { %v1721_v16 = vadd.f32 %v1720_v15, %v1719_v1  ;;  %v1728_v2 = vadd.f32 %v1727_v25, %v1726_v62  ;;  %v1599_v3 = vpop.permute.xlu1 %1598  ;;  %v2639_v1 = vld [vmem:[%s4174_s13 + $0x58] sm:$0xff]  ;;  %v2630_v15 = vld [vmem:[%s4174_s13 + $0x10] sm:$0xff] }
 0x282   :  { %v1947_v18 = vrot.slane %v1933_v9, 4  ;;  %v1639_v44 = vmul.f32 %v1599_v3, %v4022_v20  ;;  %v1640_v26 = vmul.f32 %v1599_v3, %v4028_v8  ;;  %v2640_v20 = vld [vmem:[%s4174_s13 + $0x60] sm:$0xff]  ;;  %v1962_v61 = vrot.slane %v1934_v46, 4  ;;  %v2638_v25 = vld [vmem:[%s4174_s13 + $0x50] sm:$0xff] }
 0x283   :  { %v1807_v43 = vadd.f32 %v1775_v40, %v1721_v16  ;;  %v1808_v31 = vadd.f32 %v1776_v4, %v1728_v2  ;;  %2086 = vmatpush.bf16.msrb.mxu3 %v2640_v20  ;;  %2075 = vmatpush.bf16.msrb.mxu2 %v2630_v15  ;;  %v2636_v20 = vld [vmem:[%s4174_s13 + $0x40] sm:$0xff] }
 0x284   :  { %v1729_v32 = vadd.f32 %v1639_v44, %v1637_v42  ;;  %v1736_v11 = vadd.f32 %v1640_v26, %v1638_v41  ;;  %v1948_v8 = vsel %vm1049_vm7, %v1947_v18, %v1946_v54  ;;  %v1963_v35 = vsel %vm1049_vm7, %v1962_v61, %v1961_v50  ;;  %v2629_v54 = vld [vmem:[%s4174_s13 + $0x8] sm:$0xff] }
 0x285   :  { %v1855_v38 = vmul.f32 %v1823_v12, %v1807_v43  ;;  %v1856_v27 = vmul.f32 %v1824_v48, %v1808_v31  ;;  %v1826_v18 = vrot.slane %v3622_v0, 6  ;;  %v2637_v44 = vld [vmem:[%s4174_s13 + $0x48] sm:$0xff] }
 0x286   :  { %v1730_v6 = vrot.slane %v1729_v32, 4  ;;  %v1737_v29 = vrot.slane %v1736_v11, 4 }
 0x287   :  { %v1871_v5 = vpack.c.bf16 %v1855_v38, %v1855_v38  ;;  %v1872_v37 = vpack.c.bf16 %v1856_v27, %v1856_v27  ;;  %2087 = vmatpush.bf16.msrb.mxu3 %v2639_v1  ;;  %2076 = vmatpush.bf16.msrb.mxu2 %v2629_v54  ;;  %v1779_v27 = vrot.slane %v3602_v57, 7 }
 0x288   :  { %v1731_v28 = vadd.f32 %v1730_v6, %v1729_v32  ;;  %v1738_v13 = vadd.f32 %v1737_v29, %v1736_v11 }
 0x289   :  { %v1935_v40 = vunpack.c.l.b16 %v1871_v5  ;;  %v1936_v4 = vunpack.c.l.b16 %v1872_v37  ;;  %v1612_v56 = vpop.permute.xlu1 %1611  ;;  %v1827_v37 = vrot.slane %v3619_v63, 7 }
 0x28a   :  { %v1732_v62 = vrot.slane %v1731_v28, 2  ;;  %v1739_v49 = vrot.slane %v1738_v13, 2  ;;  %v1643_v17 = vmul.f32 %v1612_v56, %v4042_v33  ;;  %v1644_v10 = vmul.f32 %v1612_v56, %v4044_v19 }
 0x28b   :  { %v1949_v23 = vrot.slane %v1935_v40, 3  ;;  %v1964_v7 = vrot.slane %v1936_v4, 3  ;;  %2088 = vmatpush.bf16.msrb.mxu3 %v2638_v25  ;;  %2077 = vmatpush.bf16.msrb.mxu2 %v2628_v14 }
 0x28c   :  { %v1733_v21 = vadd.f32 %v1732_v62, %v1731_v28  ;;  %v1740_v42 = vadd.f32 %v1739_v49, %v1738_v13  ;;  %v1743_v51 = vadd.f32 %v1643_v17, %v1641_v45  ;;  %v1750_v22 = vadd.f32 %v1644_v10, %v1642_v30 }
 0x28d   :  { %v1950_v33 = vsel %vm1052_vm6, %v1949_v23, %v1948_v8  ;;  %v1965_v19 = vsel %vm1052_vm6, %v1964_v7, %v1963_v35 }
 0x28e   :  { %v1734_v41 = vrot.slane %v1733_v21, 1  ;;  %v1741_v59 = vrot.slane %v1740_v42, 1  ;;  %v1744_v9 = vrot.slane %v1743_v51, 4  ;;  %v1751_v60 = vrot.slane %v1750_v22, 4 }
 0x28f   :  { %2089 = vmatpush.bf16.msrb.mxu3 %v2637_v44 }
 0x290   :  { %v1735_v46 = vadd.f32 %v1734_v41, %v1733_v21  ;;  %v1742_v16 = vadd.f32 %v1741_v59, %v1740_v42  ;;  %v1745_v2 = vadd.f32 %v1744_v9, %v1743_v51  ;;  %v1752_v3 = vadd.f32 %v1751_v60, %v1750_v22 }
 0x292   :  { %v1809_v26 = vadd.f32 %v1777_v55, %v1735_v46  ;;  %v1810_v12 = vadd.f32 %v1778_v47, %v1742_v16  ;;  %v1746_v48 = vrot.slane %v1745_v2, 2  ;;  %v1753_v43 = vrot.slane %v1752_v3, 2 }
 0x293   :  { %2090 = vmatpush.bf16.msrb.mxu3 %v2636_v20 }
 0x294   :  { %v1857_v31 = vmul.f32 %v1825_v34, %v1809_v26  ;;  %v1858_v36 = vmul.f32 %v1826_v18, %v1810_v12  ;;  %v1747_v32 = vadd.f32 %v1746_v48, %v1745_v2  ;;  %v1754_v11 = vadd.f32 %v1753_v43, %v1752_v3 }
 0x296   :  { %v1873_v8 = vpack.c.bf16 %v1857_v31, %v1857_v31  ;;  %v1874_v53 = vpack.c.bf16 %v1858_v36, %v1858_v36  ;;  %v1748_v61 = vrot.slane %v1747_v32, 1  ;;  %v1755_v38 = vrot.slane %v1754_v11, 1 }
 0x298   :  { %v1937_v6 = vunpack.c.l.b16 %v1873_v8  ;;  %v1938_v29 = vunpack.c.l.b16 %v1874_v53  ;;  %v1749_v45 = vadd.f32 %v1748_v61, %v1747_v32  ;;  %v1756_v5 = vadd.f32 %v1755_v38, %v1754_v11 }
 0x29a   :  { %v1811_v28 = vadd.f32 %v1779_v27, %v1749_v45  ;;  %v1812_v13 = vadd.f32 %v1780_v24, %v1756_v5  ;;  %v1951_v39 = vrot.slane %v1937_v6, 2  ;;  %v1966_v50 = vrot.slane %v1938_v29, 2 }
 0x29c   :  { %v1859_v30 = vmul.f32 %v1827_v37, %v1811_v28  ;;  %v1860_v40 = vmul.f32 %v1828_v52, %v1812_v13  ;;  %v1952_v57 = vsel %vm1055_vm8, %v1951_v39, %v1950_v33  ;;  %v1967_v58 = vsel %vm1055_vm8, %v1966_v50, %v1965_v19 }
 0x29e   :  { %v1875_v4 = vpack.c.bf16 %v1859_v30, %v1859_v30  ;;  %v1876_v56 = vpack.c.bf16 %v1860_v40, %v1860_v40 }
 0x2a0   :  { %v1939_v1 = vunpack.c.l.b16 %v1875_v4  ;;  %v1940_v35 = vunpack.c.l.b16 %v1876_v56 }
 0x2a2   :  { %v1953_v62 = vrot.slane %v1939_v1, 1  ;;  %v1968_v63 = vrot.slane %v1940_v35, 1 }
 0x2a4   :  { %v1955_v49 = vsel %vm1954_vm11, %v1953_v62, %v1952_v57  ;;  %v1969_v0 = vsel %vm1954_vm11, %v1968_v63, %v1967_v58 }
 0x2a5   :  { %v1970_v17 = vpack.c.b16 %v1955_v49, %v1955_v49  ;;  %v1971_v10 = vpack.c.b16 %v1969_v0, %v1969_v0 }
 0x2a7   :  { %2078 = vmatmul.bf16.vlgmr.msrb.gmra.mxu2 %v1970_v17  ;;  %2091 = vmatmul.bf16.vlgmr.msrb.gmra.mxu3 %v1971_v10 }
 0x32a   :  { %v2079_v23 = vpop.f32.mrf.mxu2  ;;  %v2092_v7 = vpop.f32.mrf.mxu3 }
 0x32b   :  { %v2093_v21 = vadd.f32 %v2092_v7, %v2079_v23 }
 0x32d   :  { %2096 = vst [vmem:[#allocation14] sm:$0xff] %v2093_v21 }
 0x32e   :  { %2107 = dma.vmem_to_hbm [thread:$0]  %s2103_s11, 128, %s2105_s17, [#allocation4]  }
 0x332   :  { %v2081_v42 = vpop.f32.mrf.mxu2  ;;  %v2094_v51 = vpop.f32.mrf.mxu3 }
 0x333   :  { %3017 = dma.done.wait [#allocation4], 128  }
 0x334   :  { %3018 = vsyncadd [#allocation4], 4294967168 }
 0x335   :  { %3019 = dma.done.wait [#allocation16], 5120  }
 0x336   :  { %3020 = vsyncadd [#allocation16], 4294962176 }
 0x337   :  { %2146 = vsyncpa [#allocation3], 1 }
 0x338   :  { %2147 = vsyncpa [#allocation6], 1 }
 0x339   :  { %2148 = vsyncpa [#allocation9], 1 }
 0x33a   :  { %2149 = vsyncpa [#allocation12], 1 }
 0x33b   :  { %2150 = vsyncpa [#allocation4], 1 }
 0x33c   :  { %2151 = vsyncpa [#allocation16], 1 }

</bundles_post_ra>
